<compile_context>
chip_gen: v6e
topology: v6e:2x2x1
jax: 0.10.0
libtpu: 0.0.40
codegen_flags: <defaults>
</compile_context>

<pallas_src>
import functools

import numpy as np
import jax
import jax.numpy as jnp
from jax.experimental import pallas as pl
from jax.experimental.pallas import tpu as pltpu


# ----------------------------- small math helpers -----------------------------

def _gelu(x):
    c = 0.7978845608028654  # sqrt(2/pi)
    return 0.5 * x * (1.0 + jnp.tanh(c * (x + 0.044715 * x * x * x)))


# ---------------------- tiny constant masks (numpy glue) ----------------------

def _interior_mask(n, hp, wp, off):
    """(1, n*hp*wp) 0/1 mask of the interior (ring of width `off` removed)."""
    m = np.zeros((hp, wp), np.float32)
    m[off:hp - off, off:wp - off] = 1.0
    return np.tile(m.reshape(-1), n).reshape(1, n * hp * wp)


def _pool_and_sel(n, pp):
    """poolT (n*pp, n): per-image mean weights; sel (n, n*pp): 0/1 segment select."""
    sel = np.kron(np.eye(n, dtype=np.float32), np.ones((1, pp), np.float32))
    return (sel / pp).T.astype(np.float32), sel


# --------------------------------- the kernel ---------------------------------

def senet_block_kernel(x_ref, w1_ref, b1_ref, w2_ref, b2_ref, w3_ref, b3_ref,
                       m10_ref, wse1_ref, wse2_ref, pool_ref, sel_ref,
                       wsc_ref, bsc_ref, m8_ref,
                       o_ref,
                       apad_ref, col_ref, *, wp):
    cout = w1_ref.shape[0]
    npos = x_ref.shape[1]                       # N * (H+4) * (W+4)
    margin = (apad_ref.shape[1] - npos) // 2

    x = x_ref[...]                              # (Cin, NP), channels-first

    # conv1 (1x1, padding=1) + bn1 (scale folded into w1) + gelu, evaluated on
    # the pre-padded (H+4, W+4) grid: padded columns of x are zero, so their
    # output is gelu(b1) -- exactly conv1's padding ring after BN + activation.
    a = _gelu(jnp.dot(w1_ref[...], x, preferred_element_type=jnp.float32)
              + b1_ref[...])                    # (Cout, NP)

    # Stage `a` with conv2's zero padding applied at the source (outer ring of
    # the (H+4, W+4) grid zeroed by m10) and a zero lane margin, so every 3x3
    # tap below is a plain static lane-window slice, no per-tap masks.
    apad_ref[:, :margin] = jnp.zeros((cout, margin), jnp.float32)
    apad_ref[:, margin + npos:] = jnp.zeros((cout, margin), jnp.float32)
    apad_ref[:, margin:margin + npos] = a * m10_ref[...]

    # conv2 (3x3, padding=1): im2col of 9 statically shifted copies, fused into
    # a single K = 9*Cout matmul (bn2 scale folded into w2).
    for t in range(9):
        ky, kx = t // 3, t % 3
        shift = (ky - 1) * wp + (kx - 1)
        col_ref[t * cout:(t + 1) * cout, :] = \
            apad_ref[:, margin + shift:margin + shift + npos]
    y2 = _gelu(jnp.dot(w2_ref[...], col_ref[...],
                       preferred_element_type=jnp.float32)
               + b2_ref[...])                   # (Cout, NP)

    # conv3 (1x1, padding=1) + bn3 (scale folded into w3): zero conv3's padding
    # ring (same width-1 interior mask), matmul, add bias.  The ring then holds
    # exactly b3, as in the reference.
    feat = (jnp.dot(w3_ref[...], y2 * m10_ref[...],
                    preferred_element_type=jnp.float32)
            + b3_ref[...])                      # (Cout, NP)

    # SE gate: per-image global average pool as a matmul, FC -> ReLU -> FC ->
    # sigmoid, then broadcast back to lanes with a 0/1 segment-select matmul.
    pooled = jnp.dot(feat, pool_ref[...],
                     preferred_element_type=jnp.float32)            # (Cout, N)
    z = jnp.maximum(jnp.dot(wse1_ref[...], pooled,
                            preferred_element_type=jnp.float32), 0.0)   # (Cr, N)
    gate = jax.nn.sigmoid(jnp.dot(wse2_ref[...], z,
                                  preferred_element_type=jnp.float32))  # (Cout, N)
    gate_cols = jnp.dot(gate, sel_ref[...],
                        preferred_element_type=jnp.float32)         # (Cout, NP)

    # Shortcut: 1x1 conv + BN (scale folded), zero-padded into the enlarged map.
    # TODO(synk): the PyTorch forward adds an (H, W) shortcut to the (H+4, W+4)
    # main path (shape error as written); we zero-pad it centered.
    sc = (jnp.dot(wsc_ref[...], x, preferred_element_type=jnp.float32)
          + bsc_ref[...]) * m8_ref[...]                             # (Cout, NP)

    o_ref[...] = _gelu(feat * gate_cols + sc).astype(o_ref.dtype)


# --------------------------------- wrapper -------------------------------------

_ORDER = ("w1s", "b1", "w2s", "b2", "w3s", "b3",
          "m10", "wse1t", "wse2t", "poolt", "selt",
          "wscs", "bsc", "m8")


def senet_block(x_nchw, params):
    n, cin, h, w = x_nchw.shape
    cout = params["w1"].shape[1]
    hp, wp = h + 4, w + 4
    pp = hp * wp
    npos = n * pp
    margin = ((wp + 1 + 7) // 8) * 8            # >= wp + 1 (largest tap shift)

    # Layout plumbing (XLA side): pre-pad spatially by 2, go channels-first with
    # batch*spatial flattened onto lanes.
    xp = jnp.pad(x_nchw, ((0, 0), (0, 0), (2, 2), (2, 2)))          # (N,Cin,Hp,Wp)
    xk = jnp.transpose(xp, (1, 0, 2, 3)).reshape(cin, npos)          # (Cin, NP)

    poolt, selt = _pool_and_sel(n, pp)
    colv = lambda v: v.reshape(cout, 1)
    # Fold BN scales into conv weights (constant preprocessing, done once).
    ops = dict(
        w1s=params["w1"].T * colv(params["s1"]), b1=colv(params["b1"]),
        w2s=params["w2"].reshape(9 * cout, cout).T * colv(params["s2"]),  # (Cout, 9*Cout)
        b2=colv(params["b2"]),
        w3s=params["w3"].T * colv(params["s3"]), b3=colv(params["b3"]),
        m10=jnp.asarray(_interior_mask(n, hp, wp, 1)),
        wse1t=params["wse1"].T, wse2t=params["wse2"].T,
        poolt=jnp.asarray(poolt), selt=jnp.asarray(selt),
        wscs=params["wsc"].T * colv(params["ssc"]), bsc=colv(params["bsc"]),
        m8=jnp.asarray(_interior_mask(n, hp, wp, 2)),
    )

    # Single kernel invocation for the whole (tiny) batch: per-grid-step
    # overhead would dominate this problem size.  (On v7x one could re-expose a
    # leading parallel axis to feed the second TensorCore.)
    out = pl.pallas_call(
        functools.partial(senet_block_kernel, wp=wp),
        out_shape=jax.ShapeDtypeStruct((cout, npos), jnp.float32),
        scratch_shapes=[
            pltpu.VMEM((cout, npos + 2 * margin), jnp.float32),      # lane-padded a
            pltpu.VMEM((9 * cout, npos), jnp.float32),               # im2col buffer
        ],
    )(xk, *[ops[k] for k in _ORDER])

    # (Cout, N*Hp*Wp) -> NCHW
    return jnp.transpose(out.reshape(cout, n, hp, wp), (1, 0, 2, 3))


# ----------------------------- parameter creation ------------------------------

def make_params(key, cin, cout, reduction):
    cr = max(cout // reduction, 1)
    ks = jax.random.split(key, 10)

    def bn(k, c):
        k1, k2, k3, k4 = jax.random.split(k, 4)
        gamma = 1.0 + 0.1 * jax.random.normal(k1, (c,), jnp.float32)
        beta = 0.1 * jax.random.normal(k2, (c,), jnp.float32)
        mean = 0.1 * jax.random.normal(k3, (c,), jnp.float32)
        var = 0.5 + jax.random.uniform(k4, (c,), jnp.float32)
        s = gamma / jnp.sqrt(var + 1e-5)
        b = beta - mean * s
        return s.reshape(1, c), b.reshape(1, c)

    s1, b1 = bn(ks[0], cout)
    s2, b2 = bn(ks[1], cout)
    s3, b3 = bn(ks[2], cout)
    ssc, bsc = bn(ks[3], cout)

    return dict(
        w1=0.2 * jax.random.normal(ks[4], (cin, cout), jnp.float32),
        s1=s1, b1=b1,
        # conv2 weight as 9 taps of (Cin, Cout), t = ky*3 + kx
        w2=0.1 * jax.random.normal(ks[5], (9, cout, cout), jnp.float32),
        s2=s2, b2=b2,
        w3=0.2 * jax.random.normal(ks[6], (cout, cout), jnp.float32),
        s3=s3, b3=b3,
        wse1=0.3 * jax.random.normal(ks[7], (cout, cr), jnp.float32),
        wse2=0.3 * jax.random.normal(ks[8], (cr, cout), jnp.float32),
        # in_channels != out_channels -> shortcut is Conv1x1 + BN (as in PyTorch)
        wsc=0.2 * jax.random.normal(ks[9], (cin, cout), jnp.float32),
        ssc=ssc, bsc=bsc,
    )


# ------------------------- pure-JAX reference (NHWC) ---------------------------

def reference_nhwc(x, p):
    n, h, w, cin = x.shape
    cout = p["w1"].shape[1]
    h1, w1 = h + 2, w + 2

    y = jnp.einsum("nhwc,cd->nhwd", x, p["w1"])
    y = jnp.pad(y, ((0, 0), (1, 1), (1, 1), (0, 0)))          # conv1 padding=1
    y = _gelu(y * p["s1"] + p["b1"])

    yp = jnp.pad(y, ((0, 0), (1, 1), (1, 1), (0, 0)))          # conv2 padding=1
    acc = jnp.zeros((n, h1, w1, cout), jnp.float32)
    for t in range(9):
        ky, kx = t // 3, t % 3
        acc = acc + jnp.einsum("nhwc,cd->nhwd",
                               yp[:, ky:ky + h1, kx:kx + w1, :], p["w2"][t])
    y = _gelu(acc * p["s2"] + p["b2"])

    y = jnp.einsum("nhwc,cd->nhwd", y, p["w3"])
    y = jnp.pad(y, ((0, 0), (1, 1), (1, 1), (0, 0)))          # conv3 padding=1
    y = y * p["s3"] + p["b3"]

    pooled = y.mean(axis=(1, 2))
    z = jnp.maximum(pooled @ p["wse1"], 0.0)
    gate = jax.nn.sigmoid(z @ p["wse2"])
    y = y * gate[:, None, None, :]

    sc = jnp.einsum("nhwc,cd->nhwd", x, p["wsc"]) * p["ssc"] + p["bsc"]
    sc = jnp.pad(sc, ((0, 0), (2, 2), (2, 2), (0, 0)))
    return _gelu(y + sc)


# ------------------------------------ main --------------------------------------

if __name__ == "__main__":
    N, Cin, Cout, H, W, RED = 2, 8, 16, 8, 8, 4

    key = jax.random.PRNGKey(0)
    kx, kp = jax.random.split(key)
    x_nchw = jax.random.normal(kx, (N, Cin, H, W), jnp.float32)   # PyTorch NCHW
    params = make_params(kp, Cin, Cout, RED)

    out_nchw = senet_block(x_nchw, params)
    out_nchw = jax.block_until_ready(out_nchw)
    assert out_nchw.shape == (N, Cout, H + 4, W + 4), out_nchw.shape

    # correctness check against a plain-JAX reference
    ref = reference_nhwc(jnp.transpose(x_nchw, (0, 2, 3, 1)), params)
    np.testing.assert_allclose(
        np.asarray(jnp.transpose(out_nchw, (0, 2, 3, 1))),
        np.asarray(ref), rtol=1e-2, atol=1e-2)

    print("KERNEL_OK")
</pallas_src>

<mosaic_0001>
module attributes {stable_mosaic.version = 11 : i64} {
  func.func @senet_block_kernel(%arg0: memref<8x288xf32, #tpu.memory_space<vmem>>, %arg1: memref<16x8xf32, #tpu.memory_space<vmem>>, %arg2: memref<16x1xf32, #tpu.memory_space<vmem>>, %arg3: memref<16x144xf32, #tpu.memory_space<vmem>>, %arg4: memref<16x1xf32, #tpu.memory_space<vmem>>, %arg5: memref<16x16xf32, #tpu.memory_space<vmem>>, %arg6: memref<16x1xf32, #tpu.memory_space<vmem>>, %arg7: memref<1x288xf32, #tpu.memory_space<vmem>>, %arg8: memref<4x16xf32, #tpu.memory_space<vmem>>, %arg9: memref<16x4xf32, #tpu.memory_space<vmem>>, %arg10: memref<288x2xf32, #tpu.memory_space<vmem>>, %arg11: memref<2x288xf32, #tpu.memory_space<vmem>>, %arg12: memref<16x8xf32, #tpu.memory_space<vmem>>, %arg13: memref<16x1xf32, #tpu.memory_space<vmem>>, %arg14: memref<1x288xf32, #tpu.memory_space<vmem>>, %arg15: memref<16x288xf32, #tpu.memory_space<vmem>>, %arg16: memref<16x320xf32, #tpu.memory_space<vmem>>, %arg17: memref<144x288xf32, #tpu.memory_space<vmem>>) attributes {dimension_semantics = [], scalar_prefetch = 0 : i64, scratch_operands = 2 : i64, tpu.core_type = #tpu.core_type<tc>} {
    %c0 = arith.constant 0 : index
    %c0_0 = arith.constant 0 : index
    %0 = vector.load %arg0[%c0, %c0_0] : memref<8x288xf32, #tpu.memory_space<vmem>>, vector<8x288xf32>
    %c0_1 = arith.constant 0 : index
    %c0_2 = arith.constant 0 : index
    %1 = vector.load %arg1[%c0_1, %c0_2] : memref<16x8xf32, #tpu.memory_space<vmem>>, vector<16x8xf32>
    %cst = arith.constant dense<0.000000e+00> : vector<16x288xf32>
    %2 = tpu.matmul %1, %0, %cst {dimension_numbers = #tpu.dot_dimension_numbers<[1], [0], [0], [1], [0, 0, 1, 1], [], []>} : vector<16x8xf32>, vector<8x288xf32>, vector<16x288xf32> -> vector<16x288xf32>
    %c0_3 = arith.constant 0 : index
    %c0_4 = arith.constant 0 : index
    %3 = vector.load %arg2[%c0_3, %c0_4] : memref<16x1xf32, #tpu.memory_space<vmem>>, vector<16x1xf32>
    %4 = vector.broadcast %3 : vector<16x1xf32> to vector<16x288xf32>
    %5 = arith.addf %2, %4 : vector<16x288xf32>
    %cst_5 = arith.constant 5.000000e-01 : f32
    %6 = vector.broadcast %cst_5 : f32 to vector<16x288xf32>
    %7 = arith.mulf %6, %5 : vector<16x288xf32>
    %cst_6 = arith.constant 4.471500e-02 : f32
    %8 = vector.broadcast %cst_6 : f32 to vector<16x288xf32>
    %9 = arith.mulf %8, %5 : vector<16x288xf32>
    %10 = arith.mulf %9, %5 : vector<16x288xf32>
    %11 = arith.mulf %10, %5 : vector<16x288xf32>
    %12 = arith.addf %5, %11 : vector<16x288xf32>
    %cst_7 = arith.constant 0.797884583 : f32
    %13 = vector.broadcast %cst_7 : f32 to vector<16x288xf32>
    %14 = arith.mulf %13, %12 : vector<16x288xf32>
    %15 = math.tanh %14 : vector<16x288xf32>
    %cst_8 = arith.constant 1.000000e+00 : f32
    %16 = vector.broadcast %cst_8 : f32 to vector<16x288xf32>
    %17 = arith.addf %16, %15 : vector<16x288xf32>
    %18 = arith.mulf %7, %17 : vector<16x288xf32>
    %cst_9 = arith.constant 0.000000e+00 : f32
    %19 = vector.broadcast %cst_9 : f32 to vector<16x16xf32>
    %c0_10 = arith.constant 0 : index
    %c0_11 = arith.constant 0 : index
    %20 = vector.load %arg16[%c0_10, %c0_11] : memref<16x320xf32, #tpu.memory_space<vmem>>, vector<16x16xf32>
    tpu.vector_store %arg16[%c0_10, %c0_11], %19 {strides = array<i32>} : memref<16x320xf32, #tpu.memory_space<vmem>>, vector<16x16xf32>,
    %cst_12 = arith.constant 0.000000e+00 : f32
    %21 = vector.broadcast %cst_12 : f32 to vector<16x16xf32>
    %c0_13 = arith.constant 0 : index
    %c304 = arith.constant 304 : index
    %22 = vector.load %arg16[%c0_13, %c304] : memref<16x320xf32, #tpu.memory_space<vmem>>, vector<16x16xf32>
    tpu.vector_store %arg16[%c0_13, %c304], %21 {strides = array<i32>} : memref<16x320xf32, #tpu.memory_space<vmem>>, vector<16x16xf32>,
    %c0_14 = arith.constant 0 : index
    %c0_15 = arith.constant 0 : index
    %23 = vector.load %arg7[%c0_14, %c0_15] : memref<1x288xf32, #tpu.memory_space<vmem>>, vector<1x288xf32>
    %24 = vector.broadcast %23 : vector<1x288xf32> to vector<16x288xf32>
    %25 = arith.mulf %18, %24 : vector<16x288xf32>
    %c0_16 = arith.constant 0 : index
    %c16 = arith.constant 16 : index
    %26 = vector.load %arg16[%c0_16, %c16] : memref<16x320xf32, #tpu.memory_space<vmem>>, vector<16x288xf32>
    tpu.vector_store %arg16[%c0_16, %c16], %25 {strides = array<i32>} : memref<16x320xf32, #tpu.memory_space<vmem>>, vector<16x288xf32>,
    %c0_17 = arith.constant 0 : index
    %c3 = arith.constant 3 : index
    %27 = vector.load %arg16[%c0_17, %c3] : memref<16x320xf32, #tpu.memory_space<vmem>>, vector<16x288xf32>
    %c0_18 = arith.constant 0 : index
    %c0_19 = arith.constant 0 : index
    %28 = vector.load %arg17[%c0_18, %c0_19] : memref<144x288xf32, #tpu.memory_space<vmem>>, vector<16x288xf32>
    tpu.vector_store %arg17[%c0_18, %c0_19], %27 {strides = array<i32>} : memref<144x288xf32, #tpu.memory_space<vmem>>, vector<16x288xf32>,
    %c0_20 = arith.constant 0 : index
    %c4 = arith.constant 4 : index
    %29 = vector.load %arg16[%c0_20, %c4] : memref<16x320xf32, #tpu.memory_space<vmem>>, vector<16x288xf32>
    %c16_21 = arith.constant 16 : index
    %c0_22 = arith.constant 0 : index
    %30 = vector.load %arg17[%c16_21, %c0_22] : memref<144x288xf32, #tpu.memory_space<vmem>>, vector<16x288xf32>
    tpu.vector_store %arg17[%c16_21, %c0_22], %29 {strides = array<i32>} : memref<144x288xf32, #tpu.memory_space<vmem>>, vector<16x288xf32>,
    %c0_23 = arith.constant 0 : index
    %c5 = arith.constant 5 : index
    %31 = vector.load %arg16[%c0_23, %c5] : memref<16x320xf32, #tpu.memory_space<vmem>>, vector<16x288xf32>
    %c32 = arith.constant 32 : index
    %c0_24 = arith.constant 0 : index
    %32 = vector.load %arg17[%c32, %c0_24] : memref<144x288xf32, #tpu.memory_space<vmem>>, vector<16x288xf32>
    tpu.vector_store %arg17[%c32, %c0_24], %31 {strides = array<i32>} : memref<144x288xf32, #tpu.memory_space<vmem>>, vector<16x288xf32>,
    %c0_25 = arith.constant 0 : index
    %c15 = arith.constant 15 : index
    %33 = vector.load %arg16[%c0_25, %c15] : memref<16x320xf32, #tpu.memory_space<vmem>>, vector<16x288xf32>
    %c48 = arith.constant 48 : index
    %c0_26 = arith.constant 0 : index
    %34 = vector.load %arg17[%c48, %c0_26] : memref<144x288xf32, #tpu.memory_space<vmem>>, vector<16x288xf32>
    tpu.vector_store %arg17[%c48, %c0_26], %33 {strides = array<i32>} : memref<144x288xf32, #tpu.memory_space<vmem>>, vector<16x288xf32>,
    %c0_27 = arith.constant 0 : index
    %c16_28 = arith.constant 16 : index
    %35 = vector.load %arg16[%c0_27, %c16_28] : memref<16x320xf32, #tpu.memory_space<vmem>>, vector<16x288xf32>
    %c64 = arith.constant 64 : index
    %c0_29 = arith.constant 0 : index
    %36 = vector.load %arg17[%c64, %c0_29] : memref<144x288xf32, #tpu.memory_space<vmem>>, vector<16x288xf32>
    tpu.vector_store %arg17[%c64, %c0_29], %35 {strides = array<i32>} : memref<144x288xf32, #tpu.memory_space<vmem>>, vector<16x288xf32>,
    %c0_30 = arith.constant 0 : index
    %c17 = arith.constant 17 : index
    %37 = vector.load %arg16[%c0_30, %c17] : memref<16x320xf32, #tpu.memory_space<vmem>>, vector<16x288xf32>
    %c80 = arith.constant 80 : index
    %c0_31 = arith.constant 0 : index
    %38 = vector.load %arg17[%c80, %c0_31] : memref<144x288xf32, #tpu.memory_space<vmem>>, vector<16x288xf32>
    tpu.vector_store %arg17[%c80, %c0_31], %37 {strides = array<i32>} : memref<144x288xf32, #tpu.memory_space<vmem>>, vector<16x288xf32>,
    %c0_32 = arith.constant 0 : index
    %c27 = arith.constant 27 : index
    %39 = vector.load %arg16[%c0_32, %c27] : memref<16x320xf32, #tpu.memory_space<vmem>>, vector<16x288xf32>
    %c96 = arith.constant 96 : index
    %c0_33 = arith.constant 0 : index
    %40 = vector.load %arg17[%c96, %c0_33] : memref<144x288xf32, #tpu.memory_space<vmem>>, vector<16x288xf32>
    tpu.vector_store %arg17[%c96, %c0_33], %39 {strides = array<i32>} : memref<144x288xf32, #tpu.memory_space<vmem>>, vector<16x288xf32>,
    %c0_34 = arith.constant 0 : index
    %c28 = arith.constant 28 : index
    %41 = vector.load %arg16[%c0_34, %c28] : memref<16x320xf32, #tpu.memory_space<vmem>>, vector<16x288xf32>
    %c112 = arith.constant 112 : index
    %c0_35 = arith.constant 0 : index
    %42 = vector.load %arg17[%c112, %c0_35] : memref<144x288xf32, #tpu.memory_space<vmem>>, vector<16x288xf32>
    tpu.vector_store %arg17[%c112, %c0_35], %41 {strides = array<i32>} : memref<144x288xf32, #tpu.memory_space<vmem>>, vector<16x288xf32>,
    %c0_36 = arith.constant 0 : index
    %c29 = arith.constant 29 : index
    %43 = vector.load %arg16[%c0_36, %c29] : memref<16x320xf32, #tpu.memory_space<vmem>>, vector<16x288xf32>
    %c128 = arith.constant 128 : index
    %c0_37 = arith.constant 0 : index
    %44 = vector.load %arg17[%c128, %c0_37] : memref<144x288xf32, #tpu.memory_space<vmem>>, vector<16x288xf32>
    tpu.vector_store %arg17[%c128, %c0_37], %43 {strides = array<i32>} : memref<144x288xf32, #tpu.memory_space<vmem>>, vector<16x288xf32>,
    %c0_38 = arith.constant 0 : index
    %c0_39 = arith.constant 0 : index
    %45 = vector.load %arg3[%c0_38, %c0_39] : memref<16x144xf32, #tpu.memory_space<vmem>>, vector<16x144xf32>
    %c0_40 = arith.constant 0 : index
    %c0_41 = arith.constant 0 : index
    %46 = vector.load %arg17[%c0_40, %c0_41] : memref<144x288xf32, #tpu.memory_space<vmem>>, vector<144x288xf32>
    %cst_42 = arith.constant dense<0.000000e+00> : vector<16x288xf32>
    %47 = tpu.matmul %45, %46, %cst_42 {dimension_numbers = #tpu.dot_dimension_numbers<[1], [0], [0], [1], [0, 0, 1, 1], [], []>} : vector<16x144xf32>, vector<144x288xf32>, vector<16x288xf32> -> vector<16x288xf32>
    %c0_43 = arith.constant 0 : index
    %c0_44 = arith.constant 0 : index
    %48 = vector.load %arg4[%c0_43, %c0_44] : memref<16x1xf32, #tpu.memory_space<vmem>>, vector<16x1xf32>
    %49 = vector.broadcast %48 : vector<16x1xf32> to vector<16x288xf32>
    %50 = arith.addf %47, %49 : vector<16x288xf32>
    %cst_45 = arith.constant 5.000000e-01 : f32
    %51 = vector.broadcast %cst_45 : f32 to vector<16x288xf32>
    %52 = arith.mulf %51, %50 : vector<16x288xf32>
    %cst_46 = arith.constant 4.471500e-02 : f32
    %53 = vector.broadcast %cst_46 : f32 to vector<16x288xf32>
    %54 = arith.mulf %53, %50 : vector<16x288xf32>
    %55 = arith.mulf %54, %50 : vector<16x288xf32>
    %56 = arith.mulf %55, %50 : vector<16x288xf32>
    %57 = arith.addf %50, %56 : vector<16x288xf32>
    %cst_47 = arith.constant 0.797884583 : f32
    %58 = vector.broadcast %cst_47 : f32 to vector<16x288xf32>
    %59 = arith.mulf %58, %57 : vector<16x288xf32>
    %60 = math.tanh %59 : vector<16x288xf32>
    %cst_48 = arith.constant 1.000000e+00 : f32
    %61 = vector.broadcast %cst_48 : f32 to vector<16x288xf32>
    %62 = arith.addf %61, %60 : vector<16x288xf32>
    %63 = arith.mulf %52, %62 : vector<16x288xf32>
    %c0_49 = arith.constant 0 : index
    %c0_50 = arith.constant 0 : index
    %64 = vector.load %arg5[%c0_49, %c0_50] : memref<16x16xf32, #tpu.memory_space<vmem>>, vector<16x16xf32>
    %c0_51 = arith.constant 0 : index
    %c0_52 = arith.constant 0 : index
    %65 = vector.load %arg7[%c0_51, %c0_52] : memref<1x288xf32, #tpu.memory_space<vmem>>, vector<1x288xf32>
    %66 = vector.broadcast %65 : vector<1x288xf32> to vector<16x288xf32>
    %67 = arith.mulf %63, %66 : vector<16x288xf32>
    %cst_53 = arith.constant dense<0.000000e+00> : vector<16x288xf32>
    %68 = tpu.matmul %64, %67, %cst_53 {dimension_numbers = #tpu.dot_dimension_numbers<[1], [0], [0], [1], [0, 0, 1, 1], [], []>} : vector<16x16xf32>, vector<16x288xf32>, vector<16x288xf32> -> vector<16x288xf32>
    %c0_54 = arith.constant 0 : index
    %c0_55 = arith.constant 0 : index
    %69 = vector.load %arg6[%c0_54, %c0_55] : memref<16x1xf32, #tpu.memory_space<vmem>>, vector<16x1xf32>
    %70 = vector.broadcast %69 : vector<16x1xf32> to vector<16x288xf32>
    %71 = arith.addf %68, %70 : vector<16x288xf32>
    %c0_56 = arith.constant 0 : index
    %c0_57 = arith.constant 0 : index
    %72 = vector.load %arg10[%c0_56, %c0_57] : memref<288x2xf32, #tpu.memory_space<vmem>>, vector<288x2xf32>
    %cst_58 = arith.constant dense<0.000000e+00> : vector<16x2xf32>
    %73 = tpu.matmul %71, %72, %cst_58 {dimension_numbers = #tpu.dot_dimension_numbers<[1], [0], [0], [1], [0, 0, 1, 1], [], []>} : vector<16x288xf32>, vector<288x2xf32>, vector<16x2xf32> -> vector<16x2xf32>
    %c0_59 = arith.constant 0 : index
    %c0_60 = arith.constant 0 : index
    %74 = vector.load %arg8[%c0_59, %c0_60] : memref<4x16xf32, #tpu.memory_space<vmem>>, vector<4x16xf32>
    %cst_61 = arith.constant dense<0.000000e+00> : vector<4x2xf32>
    %75 = tpu.matmul %74, %73, %cst_61 {dimension_numbers = #tpu.dot_dimension_numbers<[1], [0], [0], [1], [0, 0, 1, 1], [], []>} : vector<4x16xf32>, vector<16x2xf32>, vector<4x2xf32> -> vector<4x2xf32>
    %cst_62 = arith.constant 0.000000e+00 : f32
    %76 = vector.broadcast %cst_62 : f32 to vector<4x2xf32>
    %77 = arith.maximumf %75, %76 : vector<4x2xf32>
    %c0_63 = arith.constant 0 : index
    %c0_64 = arith.constant 0 : index
    %78 = vector.load %arg9[%c0_63, %c0_64] : memref<16x4xf32, #tpu.memory_space<vmem>>, vector<16x4xf32>
    %cst_65 = arith.constant dense<0.000000e+00> : vector<16x2xf32>
    %79 = tpu.matmul %78, %77, %cst_65 {dimension_numbers = #tpu.dot_dimension_numbers<[1], [0], [0], [1], [0, 0, 1, 1], [], []>} : vector<16x4xf32>, vector<4x2xf32>, vector<16x2xf32> -> vector<16x2xf32>
    %80 = arith.negf %79 : vector<16x2xf32>
    %81 = math.exp %80 : vector<16x2xf32>
    %cst_66 = arith.constant 1.000000e+00 : f32
    %82 = vector.broadcast %cst_66 : f32 to vector<16x2xf32>
    %83 = arith.addf %82, %81 : vector<16x2xf32>
    %84 = arith.divf %82, %83 : vector<16x2xf32>
    %c0_67 = arith.constant 0 : index
    %c0_68 = arith.constant 0 : index
    %85 = vector.load %arg11[%c0_67, %c0_68] : memref<2x288xf32, #tpu.memory_space<vmem>>, vector<2x288xf32>
    %cst_69 = arith.constant dense<0.000000e+00> : vector<16x288xf32>
    %86 = tpu.matmul %84, %85, %cst_69 {dimension_numbers = #tpu.dot_dimension_numbers<[1], [0], [0], [1], [0, 0, 1, 1], [], []>} : vector<16x2xf32>, vector<2x288xf32>, vector<16x288xf32> -> vector<16x288xf32>
    %c0_70 = arith.constant 0 : index
    %c0_71 = arith.constant 0 : index
    %87 = vector.load %arg12[%c0_70, %c0_71] : memref<16x8xf32, #tpu.memory_space<vmem>>, vector<16x8xf32>
    %cst_72 = arith.constant dense<0.000000e+00> : vector<16x288xf32>
    %88 = tpu.matmul %87, %0, %cst_72 {dimension_numbers = #tpu.dot_dimension_numbers<[1], [0], [0], [1], [0, 0, 1, 1], [], []>} : vector<16x8xf32>, vector<8x288xf32>, vector<16x288xf32> -> vector<16x288xf32>
    %c0_73 = arith.constant 0 : index
    %c0_74 = arith.constant 0 : index
    %89 = vector.load %arg13[%c0_73, %c0_74] : memref<16x1xf32, #tpu.memory_space<vmem>>, vector<16x1xf32>
    %90 = vector.broadcast %89 : vector<16x1xf32> to vector<16x288xf32>
    %91 = arith.addf %88, %90 : vector<16x288xf32>
    %c0_75 = arith.constant 0 : index
    %c0_76 = arith.constant 0 : index
    %92 = vector.load %arg14[%c0_75, %c0_76] : memref<1x288xf32, #tpu.memory_space<vmem>>, vector<1x288xf32>
    %93 = vector.broadcast %92 : vector<1x288xf32> to vector<16x288xf32>
    %94 = arith.mulf %91, %93 : vector<16x288xf32>
    %95 = arith.mulf %71, %86 : vector<16x288xf32>
    %96 = arith.addf %95, %94 : vector<16x288xf32>
    %cst_77 = arith.constant 5.000000e-01 : f32
    %97 = vector.broadcast %cst_77 : f32 to vector<16x288xf32>
    %98 = arith.mulf %97, %96 : vector<16x288xf32>
    %cst_78 = arith.constant 4.471500e-02 : f32
    %99 = vector.broadcast %cst_78 : f32 to vector<16x288xf32>
    %100 = arith.mulf %99, %96 : vector<16x288xf32>
    %101 = arith.mulf %100, %96 : vector<16x288xf32>
    %102 = arith.mulf %101, %96 : vector<16x288xf32>
    %103 = arith.addf %96, %102 : vector<16x288xf32>
    %cst_79 = arith.constant 0.797884583 : f32
    %104 = vector.broadcast %cst_79 : f32 to vector<16x288xf32>
    %105 = arith.mulf %104, %103 : vector<16x288xf32>
    %106 = math.tanh %105 : vector<16x288xf32>
    %cst_80 = arith.constant 1.000000e+00 : f32
    %107 = vector.broadcast %cst_80 : f32 to vector<16x288xf32>
    %108 = arith.addf %107, %106 : vector<16x288xf32>
    %109 = arith.mulf %98, %108 : vector<16x288xf32>
    %c0_81 = arith.constant 0 : index
    %c0_82 = arith.constant 0 : index
    %110 = vector.load %arg15[%c0_81, %c0_82] : memref<16x288xf32, #tpu.memory_space<vmem>>, vector<16x288xf32>
    tpu.vector_store %arg15[%c0_81, %c0_82], %109 {strides = array<i32>} : memref<16x288xf32, #tpu.memory_space<vmem>>, vector<16x288xf32>,
    return
  }
}

</mosaic_0001>

<bundles_post_ra>
// kernel: tpu_custom_call.1
= control target key start
LH: loop header
LB: loop body
LE: loop exit
PB: predicated region body
PF: predicated region fallthrough
CT: control target
= control target key end

     0   :  { %vm68_vm0 = vcmask 64512   ;;  %v2255_v5 = vmov 0.0   ;;  %s2920_s0 = inlined_call_operand.vmem [shape: f32[8,288], index: 0, kind: input, shape index: {}]   ;;  %s2921_s1 = inlined_call_operand.vmem [shape: f32[16,8], index: 1, kind: input, shape index: {}]   ;;  %s2922_s2 = inlined_call_operand.vmem [shape: f32[16,1], index: 2, kind: input, shape index: {}]   ;;  %s2923_s3 = inlined_call_operand.vmem [shape: f32[16,144], index: 3, kind: input, shape index: {}]   ;;  %s2924_s4 = inlined_call_operand.vmem [shape: f32[16,1], index: 4, kind: input, shape index: {}]   ;;  %s2925_s5 = inlined_call_operand.vmem [shape: f32[16,16], index: 5, kind: input, shape index: {}]   ;;  %s2926_s6 = inlined_call_operand.vmem [shape: f32[16,1], index: 6, kind: input, shape index: {}]   ;;  %s2927_s7 = inlined_call_operand.vmem [shape: f32[1,288], index: 7, kind: input, shape index: {}]   ;;  %s2928_s8 = inlined_call_operand.vmem [shape: f32[4,16], index: 8, kind: input, shape index: {}]   ;;  %s2929_s9 = inlined_call_operand.vmem [shape: f32[16,4], index: 9, kind: input, shape index: {}]   ;;  %s2930_s10 = inlined_call_operand.vmem [shape: f32[288,2], index: 10, kind: input, shape index: {}]   ;;  %s2931_s11 = inlined_call_operand.vmem [shape: f32[2,288], index: 11, kind: input, shape index: {}]   ;;  %s2932_s12 = inlined_call_operand.vmem [shape: f32[16,8], index: 12, kind: input, shape index: {}]   ;;  %s2933_s13 = inlined_call_operand.vmem [shape: f32[16,1], index: 13, kind: input, shape index: {}]   ;;  %s2934_s14 = inlined_call_operand.vmem [shape: f32[1,288], index: 14, kind: input, shape index: {}]   ;;  %s2935_s15 = inlined_call_operand.hbm [shape: f32[16,288], index: 15, kind: output, shape index: {}]  }
   0x1   :  { %v52_v0 = vld [vmem:[%s2920_s0 + $0x8] sm:$0xff]  ;;  %v53_v1 = vld [vmem:[%s2920_s0 + $0x10] sm:$0xff]  ;;  %v51_v2 = vld [vmem:[%s2920_s0] sm:$0xff]  ;;  %139 = vmatprep.mubr.f32.mxu0 %v2255_v5 }
   0x2   :  { %105 = vmatprep.subr.mxu0 %v52_v0  ;;  %2121 = vmatprep.subr.mxu1 %v53_v1  ;;  %v54_v3 = vld [vmem:[%s2921_s1] sm:$0xff]  ;;  %v55_v4 = vld [vmem:[%s2921_s1 + $0x8] sm:$0xff] }
   0x3   :  { %106 = vmatpush1.msra.mxu0 %v51_v2 }
   0x4   :  { %20 = vsyncpa [#allocation5], 0  ;;  %2122 = vmatpush3.msra.mxu1 %v53_v1  ;;  %2123 = vmatprep.mubr.msk.f32.mxu1 %vm68_vm0, %v54_v3  ;;  %v57_v6 = vld [vmem:[%s2922_s2 + $0x8] sm:$0xff]  ;;  %v2256_v7 = vmov 0   ;;  %v56_v8 = vld [vmem:[%s2922_s2] sm:$0xff]  ;;  %v289_v50 = vlaneseq  ;;  %vm281_vm1 = vcmask 130048  }
   0x5   :  { %2027 = vmatmul.mubr.msk.f32.vlgmr.msra.gmra.mxu0 %vm68_vm0, %v54_v3  ;;  %2124 = vmatmul.mubr.msk.f32.vlgmr.msra.gmra.mxu1 %vm68_vm0, %v55_v4  ;;  %282 = vst.msk [vmem:[#allocation2] sm:$0xff] %vm281_vm1, %v2255_v5  ;;  %283 = vst.msk [vmem:[#allocation2 + $0x18] sm:$0xff] %vm281_vm1, %v2255_v5  ;;  %v287_v56 = vld [vmem:[%s2927_s7] sm:$0x7]  ;;  %vm284_vm2 = vcmask 523648   ;;  %s2257_s17 = smov 16  }
   0x6   :  { %145 = vmatprep.mubr.f32.mxu0 %v2255_v5  ;;  %2183 = vset.pattern.permute.xlu0 %v2256_v7  ;;  %v2410_v54 = vshrl.u32 %v289_v50, 7  ;;  %285 = vst.msk [vmem:[#allocation2 + $0x10] sm:$0xff] %vm284_vm2, %v2255_v5  ;;  %286 = vst.msk [vmem:[#allocation2 + $0x28] sm:$0xff] %vm284_vm2, %v2255_v5  ;;  %vm338_vm3 = vcmask 1047680   ;;  %vm341_vm4 = vcmask 392192   ;;  %s2258_s18 = smov 100  }
   0x7   :  { %65 = vperm.xlu0 %2183, %v57_v6   ;;  %869 = vmatprep.subr.mxu1 %v2255_v5  ;;  %s2259_s19 = smov 101   ;;  %s2260_s20 = smov 111   ;;  %vm383_vm5 = vcmask 261120   ;;  %v1024_v50 = vld [vmem:[%s2926_s6 + $0x8] sm:$0xff]  ;;  %vm658_vm6 = vcmask 818176   ;;  %vm617_vm7 = vcmask 826368  }
   0x8   :  { %2184 = vset.pattern.permute.xlu1 %v2256_v7  ;;  %v2417_v55 = vsub.s32 2, %v2410_v54  ;;  %v2423_v57 = vsub.s32 0, %v2410_v54  ;;  %v2429_v63 = vsub.s32 1, %v2410_v54  ;;  %s2261_s21 = smov 112   ;;  %s2262_s22 = smov 113   ;;  %vm576_vm8 = vcmask 908288  }
   0x9   :  { %2028 = vmatmul.mubr.msk.f32.gmra.mxu0 %vm68_vm0, %v55_v4  ;;  %s2263_s23 = smov 123   ;;  %s2264_s24 = smov 124   ;;  %vm535_vm9 = vcmask 916480   ;;  %vm494_vm10 = vcmask 924672   ;;  %vm453_vm11 = vcmask 1006592   ;;  %vm412_vm12 = vcmask 1014784  }
   0xa   :  { %v300_v62 = vrot.slane %v287_v56, %v2417_v55  ;;  %v292_v3 = vrot.slane %v287_v56, %v2423_v57  ;;  %s2265_s25 = smov 125   ;;  %s2266_s26 = smov 99   ;;  %vm370_vm13 = vcmask 1022976   ;;  %vm699_vm14 = vcmask 809984  }
   0xb   :  { %60 = vperm.xlu0 %2183, %v56_v8   ;;  %vm2267_vm15 = vmmov 0   ;;  %vm1462_vm2 = vcmask 31744  }
  0x82   :  { %v66_v9 = vpop.permute.xlu0 %65 }
  0x86   :  { %v61_v10 = vpop.permute.xlu0 %60 }
  0xc5   :  { %v141_v11 = vpop.f32.mrf.mxu0  ;;  %v2125_v12 = vpop.f32.mrf.mxu1 }
  0xc6   :  { %v2380_v13 = vadd.f32 %v141_v11, %v61_v10  ;;  %v224_v14 = vadd.f32 %v2125_v12, %v66_v9 }
  0xc7   :  { %v143_v15 = vpop.f32.mrf.mxu0  ;;  %v218_v16 = vpop.f32.mrf.mxu1 }
  0xc8   :  { %v233_v17 = vmul.f32 0.044715, %v2380_v13  ;;  %v238_v18 = vmul.f32 0.044715, %v224_v14  ;;  %v2383_v19 = vadd.f32 %v143_v15, %v61_v10  ;;  %v2385_v20 = vadd.f32 %v218_v16, %v61_v10 }
  0xc9   :  { %v147_v21 = vpop.f32.mrf.mxu0  ;;  %v232_v60 = vmul.f32 0.5, %v224_v14  ;;  %v227_v1 = vmul.f32 0.5, %v2380_v13  ;;  %v296_v16 = vrot.slane %v287_v56, %v2429_v63 }
  0xca   :  { %v239_v22 = vmul.f32 %v233_v17, %v2380_v13  ;;  %v244_v23 = vmul.f32 %v238_v18, %v224_v14  ;;  %v234_v24 = vmul.f32 0.044715, %v2383_v19  ;;  %v235_v25 = vmul.f32 0.044715, %v2385_v20 }
  0xcb   :  { %v2390_v26 = vadd.f32 %v147_v21, %v66_v9  ;;  %v149_v27 = vpop.f32.mrf.mxu0  ;;  %v228_v7 = vmul.f32 0.5, %v2383_v19  ;;  %v229_v10 = vmul.f32 0.5, %v2385_v20 }
  0xcc   :  { %v250_v28 = vmul.f32 %v244_v23, %v224_v14  ;;  %v240_v29 = vmul.f32 %v234_v24, %v2383_v19  ;;  %v241_v30 = vmul.f32 %v235_v25, %v2385_v20  ;;  %v2394_v31 = vadd.f32 %v149_v27, %v66_v9 }
  0xcd   :  { %v236_v32 = vmul.f32 0.044715, %v2390_v26  ;;  %v245_v33 = vmul.f32 %v239_v22, %v2380_v13  ;;  %v230_v22 = vmul.f32 0.5, %v2390_v26 }
  0xce   :  { %v246_v34 = vmul.f32 %v240_v29, %v2383_v19  ;;  %v247_v35 = vmul.f32 %v241_v30, %v2385_v20  ;;  %v237_v36 = vmul.f32 0.044715, %v2394_v31  ;;  %v256_v37 = vadd.f32 %v250_v28, %v224_v14 }
  0xcf   :  { %v242_v38 = vmul.f32 %v236_v32, %v2390_v26  ;;  %v251_v39 = vadd.f32 %v245_v33, %v2380_v13 }
  0xd0   :  { %v243_v40 = vmul.f32 %v237_v36, %v2394_v31  ;;  %v262_v41 = vmul.f32 0.7978846, %v256_v37  ;;  %v252_v42 = vadd.f32 %v246_v34, %v2383_v19  ;;  %v253_v43 = vadd.f32 %v247_v35, %v2385_v20 }
  0xd1   :  { %v248_v44 = vmul.f32 %v242_v38, %v2390_v26  ;;  %v257_v45 = vmul.f32 0.7978846, %v251_v39  ;;  %v231_v20 = vmul.f32 0.5, %v2394_v31 }
  0xd2   :  { %v249_v46 = vmul.f32 %v243_v40, %v2394_v31  ;;  %2186 = vtanh.f32 %v262_v41  ;;  %v258_v47 = vmul.f32 0.7978846, %v252_v42  ;;  %v259_v48 = vmul.f32 0.7978846, %v253_v43  ;;  %v717_v43 = vld [vmem:[%s2923_s3 + $0x8] sm:$0xff] }
  0xd3   :  { %2188 = vtanh.f32 %v257_v45  ;;  %v254_v49 = vadd.f32 %v248_v44, %v2390_v26  ;;  %2033 = vmatprep.mubr.msk.f32.mxu1 %vm281_vm1, %v717_v43  ;;  %2031 = vmatprep.mubr.msk.f32.mxu0 %vm281_vm1, %v717_v43  ;;  %v775_v44 = vld [vmem:[%s2924_s4 + $0x8] sm:$0xff] }
  0xd4   :  { %2190 = vtanh.f32 %v258_v47  ;;  %v255_v51 = vadd.f32 %v249_v46, %v2394_v31  ;;  %v1023_v46 = vld [vmem:[%s2926_s6] sm:$0xff] }
  0xd5   :  { %2192 = vtanh.f32 %v259_v48  ;;  %v260_v52 = vmul.f32 0.7978846, %v254_v49  ;;  %v774_v47 = vld [vmem:[%s2924_s4] sm:$0xff] }
  0xd6   :  { %v261_v53 = vmul.f32 0.7978846, %v255_v51  ;;  %v1746_v49 = vld [vmem:[%s2933_s13] sm:$0xff] }
  0xd7   :  { %2194 = vtanh.f32 %v260_v52 }
  0xd8   :  { %2196 = vtanh.f32 %v261_v53  ;;  %v1747_v53 = vld [vmem:[%s2933_s13 + $0x8] sm:$0xff] }
  0xdf   :  { %v2187_v58 = vpop.eup %2186 }
  0xe0   :  { %v2189_v59 = vpop.eup %2188  ;;  %v274_v61 = vadd.f32 1.0, %v2187_v58 }
  0xe1   :  { %v2191_v0 = vpop.eup %2190  ;;  %v269_v2 = vadd.f32 1.0, %v2189_v59 }
  0xe2   :  { %v2193_v4 = vpop.eup %2192  ;;  %v280_v6 = vmul.f32 %v274_v61, %v232_v60  ;;  %v270_v8 = vadd.f32 1.0, %v2191_v0 }
  0xe3   :  { %v275_v9 = vmul.f32 %v269_v2, %v227_v1  ;;  %v271_v11 = vadd.f32 1.0, %v2193_v4 }
  0xe4   :  { %v2195_v12 = vpop.eup %2194  ;;  %v309_v14 = vmul.f32 %v300_v62, %v280_v6  ;;  %v276_v15 = vmul.f32 %v270_v8, %v228_v7 }
  0xe5   :  { %v304_v17 = vmul.f32 %v292_v3, %v275_v9  ;;  %v277_v18 = vmul.f32 %v271_v11, %v229_v10  ;;  %v272_v13 = vadd.f32 1.0, %v2195_v12  ;;  %v2197_v21 = vpop.eup %2196 }
  0xe6   :  { %326 = vrot.lane.b32.xlu0 %v309_v14, %s2257_s17  ;;  %v305_v19 = vmul.f32 %v296_v16, %v276_v15  ;;  %v273_v25 = vadd.f32 1.0, %v2197_v21 }
  0xe7   :  { %316 = vrot.lane.b32.xlu1 %v304_v17, %s2257_s17  ;;  %v306_v23 = vmul.f32 %v300_v62, %v277_v18  ;;  %v278_v24 = vmul.f32 %v272_v13, %v230_v22 }
  0xe8   :  { %v279_v28 = vmul.f32 %v273_v25, %v231_v20 }
  0xe9   :  { %v307_v27 = vmul.f32 %v292_v3, %v278_v24 }
  0xea   :  { %318 = vrot.lane.b32.xlu0 %v305_v19, %s2257_s17  ;;  %v308_v29 = vmul.f32 %v296_v16, %v279_v28 }
  0xeb   :  { %320 = vrot.lane.b32.xlu1 %v306_v23, %s2257_s17 }
  0xef   :  { %322 = vrot.lane.b32.xlu1 %v307_v27, %s2257_s17 }
  0xf3   :  { %324 = vrot.lane.b32.xlu1 %v308_v29, %s2257_s17 }
 0x158   :  { %v327_v30 = vpop.permute.xlu0 %326 }
 0x159   :  { %v317_v32 = vpop.permute.xlu1 %316 }
 0x15a   :  { %339 = vst.msk [vmem:[#allocation2] sm:$0xff] %vm338_vm3, %v317_v32 }
 0x15c   :  { %v319_v33 = vpop.permute.xlu0 %318 }
 0x15d   :  { %v328_v26 = vsel %vm281_vm1, %v317_v32, %v319_v33  ;;  %v321_v34 = vpop.permute.xlu1 %320 }
 0x15e   :  { %v329_v35 = vsel %vm281_vm1, %v319_v33, %v321_v34 }
 0x15f   :  { %342 = vst.msk [vmem:[#allocation2 + $0x10] sm:$0xff] %vm341_vm4, %v329_v35 }
 0x161   :  { %v323_v36 = vpop.permute.xlu1 %322  ;;  %v2441_v31 = vld [vmem:[#allocation2] sm:$0xff] }
 0x162   :  { %343 = vst.msk [vmem:[#allocation2 + $0x18] sm:$0xff] %vm338_vm3, %v323_v36  ;;  %646 = vrot.lane.b32.xlu1 %v2441_v31, %s2258_s18  ;;  %vm1469_vm3 = vcmask 1043456  }
 0x165   :  { %v325_v37 = vpop.permute.xlu1 %324 }
 0x166   :  { %v2446_v38 = vsel %vm281_vm1, %v323_v36, %v325_v37  ;;  %v331_v39 = vsel %vm281_vm1, %v325_v37, %v327_v30  ;;  %605 = vrot.lane.b32.xlu1 %v2441_v31, %s2259_s19  ;;  %v2451_v40 = vld [vmem:[#allocation2 + $0x10] sm:$0xff] }
 0x167   :  { %345 = vst.msk [vmem:[#allocation2 + $0x28] sm:$0xff] %vm341_vm4, %v331_v39  ;;  %650 = vrot.lane.b32.xlu0 %v2451_v40, %s2258_s18  ;;  %vm1578_vm4 = vcmask 15360  }
 0x169   :  { %v637_v41 = vld [vmem:[#allocation2 + $0x18] sm:$0xff] }
 0x16a   :  { %564 = vrot.lane.b32.xlu1 %v2441_v31, %s2260_s20 }
 0x16b   :  { %609 = vrot.lane.b32.xlu0 %v2451_v40, %s2259_s19 }
 0x16e   :  { %523 = vrot.lane.b32.xlu1 %v2441_v31, %s2261_s21  ;;  %v639_v42 = vld [vmem:[#allocation2 + $0x28] sm:$0xff] }
 0x16f   :  { %568 = vrot.lane.b32.xlu0 %v2451_v40, %s2260_s20 }
 0x172   :  { %482 = vrot.lane.b32.xlu1 %v2441_v31, %s2262_s22 }
 0x173   :  { %527 = vrot.lane.b32.xlu0 %v2451_v40, %s2261_s21 }
 0x176   :  { %441 = vrot.lane.b32.xlu1 %v2441_v31, %s2263_s23 }
 0x177   :  { %486 = vrot.lane.b32.xlu0 %v2451_v40, %s2262_s22 }
 0x17a   :  { %400 = vrot.lane.b32.xlu1 %v2441_v31, %s2264_s24 }
 0x17b   :  { %445 = vrot.lane.b32.xlu0 %v2451_v40, %s2263_s23 }
 0x17e   :  { %358 = vrot.lane.b32.xlu1 %v2441_v31, %s2265_s25 }
 0x17f   :  { %404 = vrot.lane.b32.xlu0 %v2451_v40, %s2264_s24 }
 0x182   :  { %648 = vrot.lane.b32.xlu1 %v328_v26, %s2258_s18 }
 0x183   :  { %362 = vrot.lane.b32.xlu0 %v2451_v40, %s2265_s25 }
 0x186   :  { %607 = vrot.lane.b32.xlu1 %v328_v26, %s2259_s19 }
 0x187   :  { %652 = vrot.lane.b32.xlu0 %v637_v41, %s2258_s18 }
 0x18a   :  { %566 = vrot.lane.b32.xlu1 %v328_v26, %s2260_s20 }
 0x18b   :  { %611 = vrot.lane.b32.xlu0 %v637_v41, %s2259_s19 }
 0x18e   :  { %525 = vrot.lane.b32.xlu1 %v328_v26, %s2261_s21 }
 0x18f   :  { %570 = vrot.lane.b32.xlu0 %v637_v41, %s2260_s20 }
 0x192   :  { %484 = vrot.lane.b32.xlu1 %v328_v26, %s2262_s22 }
 0x193   :  { %529 = vrot.lane.b32.xlu0 %v637_v41, %s2261_s21 }
 0x196   :  { %443 = vrot.lane.b32.xlu1 %v328_v26, %s2263_s23 }
 0x197   :  { %488 = vrot.lane.b32.xlu0 %v637_v41, %s2262_s22 }
 0x19a   :  { %402 = vrot.lane.b32.xlu1 %v328_v26, %s2264_s24 }
 0x19b   :  { %447 = vrot.lane.b32.xlu0 %v637_v41, %s2263_s23 }
 0x19e   :  { %360 = vrot.lane.b32.xlu1 %v328_v26, %s2265_s25 }
 0x19f   :  { %406 = vrot.lane.b32.xlu0 %v637_v41, %s2264_s24 }
 0x1a2   :  { %689 = vrot.lane.b32.xlu1 %v328_v26, %s2266_s26 }
 0x1a3   :  { %364 = vrot.lane.b32.xlu0 %v637_v41, %s2265_s25 }
 0x1a6   :  { %656 = vrot.lane.b32.xlu1 %v639_v42, %s2258_s18 }
 0x1a7   :  { %693 = vrot.lane.b32.xlu0 %v637_v41, %s2266_s26 }
 0x1aa   :  { %615 = vrot.lane.b32.xlu1 %v639_v42, %s2259_s19 }
 0x1ab   :  { %654 = vrot.lane.b32.xlu0 %v2446_v38, %s2258_s18 }
 0x1ae   :  { %574 = vrot.lane.b32.xlu1 %v639_v42, %s2260_s20 }
 0x1af   :  { %613 = vrot.lane.b32.xlu0 %v2446_v38, %s2259_s19 }
 0x1b2   :  { %533 = vrot.lane.b32.xlu1 %v639_v42, %s2261_s21 }
 0x1b3   :  { %572 = vrot.lane.b32.xlu0 %v2446_v38, %s2260_s20 }
 0x1b6   :  { %492 = vrot.lane.b32.xlu1 %v639_v42, %s2262_s22 }
 0x1b7   :  { %531 = vrot.lane.b32.xlu0 %v2446_v38, %s2261_s21 }
 0x1ba   :  { %451 = vrot.lane.b32.xlu1 %v639_v42, %s2263_s23 }
 0x1bb   :  { %490 = vrot.lane.b32.xlu0 %v2446_v38, %s2262_s22 }
 0x1be   :  { %410 = vrot.lane.b32.xlu1 %v639_v42, %s2264_s24 }
 0x1bf   :  { %449 = vrot.lane.b32.xlu0 %v2446_v38, %s2263_s23 }
 0x1c2   :  { %368 = vrot.lane.b32.xlu1 %v639_v42, %s2265_s25 }
 0x1c3   :  { %408 = vrot.lane.b32.xlu0 %v2446_v38, %s2264_s24 }
 0x1c6   :  { %697 = vrot.lane.b32.xlu1 %v639_v42, %s2266_s26 }
 0x1c7   :  { %366 = vrot.lane.b32.xlu0 %v2446_v38, %s2265_s25 }
 0x1ca   :  { %687 = vrot.lane.b32.xlu1 %v2441_v31, %s2266_s26 }
 0x1cb   :  { %695 = vrot.lane.b32.xlu0 %v2446_v38, %s2266_s26 }
 0x1ce   :  { %778 = vperm.xlu1 %2184, %v774_v47  }
 0x1cf   :  { %691 = vrot.lane.b32.xlu0 %v2451_v40, %s2266_s26 }
 0x1d2   :  { %1032 = vperm.xlu1 %2184, %v1024_v50  }
 0x1d3   :  { %783 = vperm.xlu0 %2183, %v775_v44  }
 0x1d4   :  { %v647_v45 = vpop.permute.xlu1 %646 }
 0x1d6   :  { %1755 = vperm.xlu1 %2184, %v1747_v53  }
 0x1d7   :  { %1027 = vperm.xlu0 %2183, %v1023_v46  }
 0x1d8   :  { %v606_v48 = vpop.permute.xlu1 %605 }
 0x1d9   :  { %v651_v51 = vpop.permute.xlu0 %650 }
 0x1da   :  { %671 = vst.msk [vmem:[#allocation3 + $0x160] sm:$0xff] %vm383_vm5, %v651_v51 }
 0x1db   :  { %1750 = vperm.xlu0 %2183, %v1746_v49  }
 0x1dc   :  { %v565_v52 = vpop.permute.xlu1 %564 }
 0x1dd   :  { %v610_v56 = vpop.permute.xlu0 %609 }
 0x1de   :  { %630 = vst.msk [vmem:[#allocation3 + $0x130] sm:$0xff] %vm383_vm5, %v610_v56 }
 0x1e0   :  { %v524_v58 = vpop.permute.xlu1 %523 }
 0x1e1   :  { %v569_v59 = vpop.permute.xlu0 %568 }
 0x1e2   :  { %589 = vst.msk [vmem:[#allocation3 + $0x100] sm:$0xff] %vm383_vm5, %v569_v59 }
 0x1e4   :  { %v483_v60 = vpop.permute.xlu1 %482 }
 0x1e5   :  { %v528_v61 = vpop.permute.xlu0 %527 }
 0x1e6   :  { %548 = vst.msk [vmem:[#allocation3 + $0xd0] sm:$0xff] %vm383_vm5, %v528_v61 }
 0x1e8   :  { %v442_v62 = vpop.permute.xlu1 %441 }
 0x1e9   :  { %v487_v0 = vpop.permute.xlu0 %486 }
 0x1ea   :  { %507 = vst.msk [vmem:[#allocation3 + $0xa0] sm:$0xff] %vm383_vm5, %v487_v0 }
 0x1ec   :  { %v401_v1 = vpop.permute.xlu1 %400 }
 0x1ed   :  { %v446_v2 = vpop.permute.xlu0 %445 }
 0x1ee   :  { %466 = vst.msk [vmem:[#allocation3 + $0x70] sm:$0xff] %vm383_vm5, %v446_v2 }
 0x1f0   :  { %v359_v3 = vpop.permute.xlu1 %358 }
 0x1f1   :  { %v405_v4 = vpop.permute.xlu0 %404 }
 0x1f2   :  { %425 = vst.msk [vmem:[#allocation3 + $0x40] sm:$0xff] %vm383_vm5, %v405_v4 }
 0x1f4   :  { %v649_v6 = vpop.permute.xlu1 %648 }
 0x1f5   :  { %v659_v7 = vsel %vm658_vm6, %v647_v45, %v649_v6  ;;  %v660_v8 = vsel %vm658_vm6, %v649_v6, %v651_v51  ;;  %v363_v9 = vpop.permute.xlu0 %362  ;;  %v764_v51 = vld [vmem:[#allocation3 + $0x160] sm:$0xff] }
 0x1f6   :  { %384 = vst.msk [vmem:[#allocation3 + $0x10] sm:$0xff] %vm383_vm5, %v363_v9 }
 0x1f8   :  { %v608_v10 = vpop.permute.xlu1 %607 }
 0x1f9   :  { %v2559_v11 = vsel %vm617_vm7, %v606_v48, %v608_v10  ;;  %v2562_v12 = vsel %vm617_vm7, %v608_v10, %v610_v56  ;;  %v653_v14 = vpop.permute.xlu0 %652  ;;  %v746_v10 = vld [vmem:[#allocation3 + $0xd0] sm:$0xff] }
 0x1fc   :  { %v567_v15 = vpop.permute.xlu1 %566 }
 0x1fd   :  { %v2565_v16 = vsel %vm576_vm8, %v565_v52, %v567_v15  ;;  %v2568_v17 = vsel %vm576_vm8, %v567_v15, %v569_v59  ;;  %v612_v18 = vpop.permute.xlu0 %611 }
 0x200   :  { %v526_v13 = vpop.permute.xlu1 %525 }
 0x201   :  { %v2571_v21 = vsel %vm535_vm9, %v524_v58, %v526_v13  ;;  %v2574_v22 = vsel %vm535_vm9, %v526_v13, %v528_v61  ;;  %v571_v19 = vpop.permute.xlu0 %570 }
 0x204   :  { %v485_v23 = vpop.permute.xlu1 %484 }
 0x205   :  { %v2577_v24 = vsel %vm494_vm10, %v483_v60, %v485_v23  ;;  %v2580_v25 = vsel %vm494_vm10, %v485_v23, %v487_v0  ;;  %v2582_v20 = vpop.permute.xlu0 %529  ;;  %v758_v60 = vld [vmem:[#allocation3 + $0x130] sm:$0xff] }
 0x206   :  { %v734_v23 = vld [vmem:[#allocation3 + $0x70] sm:$0xff] }
 0x208   :  { %v444_v27 = vpop.permute.xlu1 %443 }
 0x209   :  { %v2585_v28 = vsel %vm453_vm11, %v442_v62, %v444_v27  ;;  %v2588_v29 = vsel %vm453_vm11, %v444_v27, %v446_v2  ;;  %v2590_v30 = vpop.permute.xlu0 %488 }
 0x20c   :  { %v403_v32 = vpop.permute.xlu1 %402 }
 0x20d   :  { %v2593_v33 = vsel %vm412_vm12, %v401_v1, %v403_v32  ;;  %v2596_v26 = vsel %vm412_vm12, %v403_v32, %v405_v4  ;;  %v2598_v34 = vpop.permute.xlu0 %447 }
 0x210   :  { %v361_v35 = vpop.permute.xlu1 %360 }
 0x211   :  { %v2601_v36 = vsel %vm370_vm13, %v359_v3, %v361_v35  ;;  %v2604_v31 = vsel %vm370_vm13, %v361_v35, %v363_v9  ;;  %v2606_v37 = vpop.permute.xlu0 %406  ;;  %v752_v3 = vld [vmem:[#allocation3 + $0x100] sm:$0xff] }
 0x214   :  { %v2608_v38 = vpop.permute.xlu1 %689 }
 0x215   :  { %v2610_v39 = vpop.permute.xlu0 %364 }
 0x218   :  { %v657_v40 = vpop.permute.xlu1 %656 }
 0x219   :  { %674 = vst.msk [vmem:[#allocation3 + $0x178] sm:$0xff] %vm383_vm5, %v657_v40  ;;  %v2613_v41 = vpop.permute.xlu0 %693 }
 0x21c   :  { %v616_v42 = vpop.permute.xlu1 %615 }
 0x21d   :  { %633 = vst.msk [vmem:[#allocation3 + $0x148] sm:$0xff] %vm383_vm5, %v616_v42  ;;  %v655_v43 = vpop.permute.xlu0 %654 }
 0x21e   :  { %v661_v44 = vsel %vm658_vm6, %v653_v14, %v655_v43  ;;  %v662_v45 = vsel %vm658_vm6, %v655_v43, %v657_v40  ;;  %v2698_v43 = vld [vmem:[%s2925_s5] sm:$0xff] }
 0x21f   :  { %792 = vmatprep.subr.mxu0 %v662_v45 }
 0x220   :  { %v575_v46 = vpop.permute.xlu1 %574  ;;  %v767_v47 = vld [vmem:[#allocation3 + $0x178] sm:$0xff]  ;;  %793 = vmatpush1.msra.mxu0 %v661_v44 }
 0x221   :  { %592 = vst.msk [vmem:[#allocation3 + $0x118] sm:$0xff] %vm383_vm5, %v575_v46  ;;  %v614_v48 = vpop.permute.xlu0 %613  ;;  %870 = vmatpush1.msra.mxu1 %v767_v47  ;;  %794 = vmatprep.subr.mxu0 %v660_v8 }
 0x222   :  { %v620_v49 = vsel %vm617_vm7, %v612_v18, %v614_v48  ;;  %v621_v50 = vsel %vm617_vm7, %v614_v48, %v616_v42  ;;  %871 = vmatprep.subr.mxu1 %v2255_v5  ;;  %795 = vmatpush1.msra.mxu0 %v659_v7  ;;  %v718_v42 = vld [vmem:[%s2923_s3 + $0x10] sm:$0xff] }
 0x223   :  { %872 = vmatpush1.msra.mxu1 %v764_v51  ;;  %796 = vmatprep.subr.mxu0 %v621_v50 }
 0x224   :  { %873 = vmatprep.subr.mxu1 %v2255_v5  ;;  %v534_v52 = vpop.permute.xlu1 %533  ;;  %v761_v53 = vld [vmem:[#allocation3 + $0x148] sm:$0xff]  ;;  %797 = vmatpush1.msra.mxu0 %v620_v49 }
 0x225   :  { %551 = vst.msk [vmem:[#allocation3 + $0xe8] sm:$0xff] %vm383_vm5, %v534_v52  ;;  %v573_v56 = vpop.permute.xlu0 %572  ;;  %874 = vmatpush1.msra.mxu1 %v761_v53  ;;  %798 = vmatprep.subr.mxu0 %v2562_v12 }
 0x226   :  { %v579_v58 = vsel %vm576_vm8, %v571_v19, %v573_v56  ;;  %v580_v59 = vsel %vm576_vm8, %v573_v56, %v575_v46  ;;  %875 = vmatprep.subr.mxu1 %v2255_v5  ;;  %799 = vmatpush1.msra.mxu0 %v2559_v11 }
 0x227   :  { %876 = vmatpush1.msra.mxu1 %v758_v60  ;;  %800 = vmatprep.subr.mxu0 %v580_v59 }
 0x228   :  { %877 = vmatprep.subr.mxu1 %v2255_v5  ;;  %v493_v61 = vpop.permute.xlu1 %492  ;;  %v755_v62 = vld [vmem:[#allocation3 + $0x118] sm:$0xff]  ;;  %801 = vmatpush1.msra.mxu0 %v579_v58 }
 0x229   :  { %510 = vst.msk [vmem:[#allocation3 + $0xb8] sm:$0xff] %vm383_vm5, %v493_v61  ;;  %v532_v0 = vpop.permute.xlu0 %531  ;;  %878 = vmatpush1.msra.mxu1 %v755_v62  ;;  %802 = vmatprep.subr.mxu0 %v2568_v17  ;;  %v740_v17 = vld [vmem:[#allocation3 + $0xa0] sm:$0xff] }
 0x22a   :  { %v538_v1 = vsel %vm535_vm9, %v2582_v20, %v532_v0  ;;  %v539_v2 = vsel %vm535_vm9, %v532_v0, %v534_v52  ;;  %879 = vmatprep.subr.mxu1 %v2255_v5  ;;  %803 = vmatpush1.msra.mxu0 %v2565_v16 }
 0x22b   :  { %880 = vmatpush1.msra.mxu1 %v752_v3  ;;  %804 = vmatprep.subr.mxu0 %v539_v2 }
 0x22c   :  { %881 = vmatprep.subr.mxu1 %v2255_v5  ;;  %v452_v4 = vpop.permute.xlu1 %451  ;;  %v749_v6 = vld [vmem:[#allocation3 + $0xe8] sm:$0xff]  ;;  %805 = vmatpush1.msra.mxu0 %v538_v1 }
 0x22d   :  { %469 = vst.msk [vmem:[#allocation3 + $0x88] sm:$0xff] %vm383_vm5, %v452_v4  ;;  %v491_v7 = vpop.permute.xlu0 %490  ;;  %882 = vmatpush1.msra.mxu1 %v749_v6  ;;  %806 = vmatprep.subr.mxu0 %v2574_v22 }
 0x22e   :  { %v497_v8 = vsel %vm494_vm10, %v2590_v30, %v491_v7  ;;  %v498_v9 = vsel %vm494_vm10, %v491_v7, %v493_v61  ;;  %883 = vmatprep.subr.mxu1 %v2255_v5  ;;  %807 = vmatpush1.msra.mxu0 %v2571_v21 }
 0x22f   :  { %884 = vmatpush1.msra.mxu1 %v746_v10  ;;  %808 = vmatprep.subr.mxu0 %v498_v9 }
 0x230   :  { %885 = vmatprep.subr.mxu1 %v2255_v5  ;;  %v411_v11 = vpop.permute.xlu1 %410  ;;  %v743_v12 = vld [vmem:[#allocation3 + $0xb8] sm:$0xff]  ;;  %809 = vmatpush1.msra.mxu0 %v497_v8 }
 0x231   :  { %428 = vst.msk [vmem:[#allocation3 + $0x58] sm:$0xff] %vm383_vm5, %v411_v11  ;;  %v450_v14 = vpop.permute.xlu0 %449  ;;  %886 = vmatpush1.msra.mxu1 %v743_v12  ;;  %810 = vmatprep.subr.mxu0 %v2580_v25 }
 0x232   :  { %v456_v15 = vsel %vm453_vm11, %v2598_v34, %v450_v14  ;;  %v457_v16 = vsel %vm453_vm11, %v450_v14, %v452_v4  ;;  %887 = vmatprep.subr.mxu1 %v2255_v5  ;;  %811 = vmatpush1.msra.mxu0 %v2577_v24 }
 0x233   :  { %888 = vmatpush1.msra.mxu1 %v740_v17  ;;  %812 = vmatprep.subr.mxu0 %v457_v16 }
 0x234   :  { %889 = vmatprep.subr.mxu1 %v2255_v5  ;;  %v369_v18 = vpop.permute.xlu1 %368  ;;  %v737_v13 = vld [vmem:[#allocation3 + $0x88] sm:$0xff]  ;;  %813 = vmatpush1.msra.mxu0 %v456_v15 }
 0x235   :  { %387 = vst.msk [vmem:[#allocation3 + $0x28] sm:$0xff] %vm383_vm5, %v369_v18  ;;  %v409_v21 = vpop.permute.xlu0 %408  ;;  %890 = vmatpush1.msra.mxu1 %v737_v13  ;;  %814 = vmatprep.subr.mxu0 %v2588_v29 }
 0x236   :  { %v415_v22 = vsel %vm412_vm12, %v2606_v37, %v409_v21  ;;  %v416_v19 = vsel %vm412_vm12, %v409_v21, %v411_v11  ;;  %891 = vmatprep.subr.mxu1 %v2255_v5  ;;  %815 = vmatpush1.msra.mxu0 %v2585_v28  ;;  %v728_v28 = vld [vmem:[#allocation3 + $0x40] sm:$0xff] }
 0x237   :  { %892 = vmatpush1.msra.mxu1 %v734_v23  ;;  %816 = vmatprep.subr.mxu0 %v416_v19 }
 0x238   :  { %893 = vmatprep.subr.mxu1 %v2255_v5  ;;  %v698_v24 = vpop.permute.xlu1 %697  ;;  %v731_v25 = vld [vmem:[#allocation3 + $0x58] sm:$0xff]  ;;  %817 = vmatpush1.msra.mxu0 %v415_v22 }
 0x239   :  { %715 = vst.msk [vmem:[#allocation3 + $0x1a8] sm:$0xff] %vm383_vm5, %v698_v24  ;;  %v367_v20 = vpop.permute.xlu0 %366  ;;  %894 = vmatpush1.msra.mxu1 %v731_v25  ;;  %818 = vmatprep.subr.mxu0 %v2596_v26 }
 0x23a   :  { %v373_v27 = vsel %vm370_vm13, %v2610_v39, %v367_v20  ;;  %v374_v29 = vsel %vm370_vm13, %v367_v20, %v369_v18  ;;  %895 = vmatprep.subr.mxu1 %v2255_v5  ;;  %819 = vmatpush1.msra.mxu0 %v2593_v33  ;;  %v722_v33 = vld [vmem:[#allocation3 + $0x10] sm:$0xff] }
 0x23b   :  { %896 = vmatpush1.msra.mxu1 %v728_v28  ;;  %820 = vmatprep.subr.mxu0 %v374_v29 }
 0x23c   :  { %897 = vmatprep.subr.mxu1 %v2255_v5  ;;  %v688_v30 = vpop.permute.xlu1 %687  ;;  %v725_v32 = vld [vmem:[#allocation3 + $0x28] sm:$0xff]  ;;  %821 = vmatpush1.msra.mxu0 %v373_v27 }
 0x23d   :  { %v700_v26 = vsel %vm699_vm14, %v688_v30, %v2608_v38  ;;  %v696_v34 = vpop.permute.xlu0 %695  ;;  %898 = vmatpush1.msra.mxu1 %v725_v32  ;;  %822 = vmatprep.subr.mxu0 %v2604_v31 }
 0x23e   :  { %v702_v35 = vsel %vm699_vm14, %v2613_v41, %v696_v34  ;;  %v703_v37 = vsel %vm699_vm14, %v696_v34, %v698_v24  ;;  %899 = vmatprep.subr.mxu1 %v2255_v5  ;;  %823 = vmatpush1.msra.mxu0 %v2601_v36  ;;  %v716_v41 = vld [vmem:[%s2923_s3] sm:$0xff]  ;;  %v719_v36 = vld [vmem:[%s2923_s3 + $0x18] sm:$0xff] }
 0x23f   :  { %900 = vmatpush1.msra.mxu1 %v722_v33  ;;  %852 = vmatprep.subr.mxu0 %v703_v37 }
 0x240   :  { %929 = vmatprep.subr.mxu1 %v2255_v5  ;;  %v773_v39 = vld [vmem:[#allocation3 + $0x1a8] sm:$0xff]  ;;  %853 = vmatpush2.msra.mxu0 %v702_v35 }
 0x241   :  { %v692_v40 = vpop.permute.xlu0 %691  ;;  %930 = vmatpush2.msra.mxu1 %v773_v39 }
 0x242   :  { %v701_v31 = vsel %vm699_vm14, %v2608_v38, %v692_v40  ;;  %712 = vst.msk [vmem:[#allocation3 + $0x190] sm:$0xff] %vm383_vm5, %v692_v40  ;;  %931 = vmatprep.subr.mxu1 %v2255_v5 }
 0x243   :  { %854 = vmatprep.subr.mxu0 %v701_v31 }
 0x244   :  { %855 = vmatpush2.msra.mxu0 %v700_v26 }
 0x245   :  { %857 = vmatmul.mubr.f32.vlgmr.msra.gmra.mxu0 %v716_v41 }
 0x246   :  { %2032 = vmatprep.mubr.msk.f32.mxu0 %vm281_vm1, %v719_v36 }
 0x249   :  { %v770_v38 = vld [vmem:[#allocation3 + $0x190] sm:$0xff]  ;;  %863 = vmatmul.mubr.f32.gmra.mxu0 %v718_v42  ;;  %v779_v44 = vpop.permute.xlu1 %778 }
 0x24a   :  { %932 = vmatpush2.msra.mxu1 %v770_v38  ;;  %1105 = vmatprep.mubr.f32.mxu0 %v2255_v5 }
 0x24b   :  { %934 = vmatmul.mubr.f32.vlgmr.msra.gmra.mxu1 %v716_v41 }
 0x24c   :  { %2034 = vmatprep.mubr.msk.f32.mxu1 %vm281_vm1, %v719_v36  ;;  %v1000_v36 = vld [vmem:[%s2927_s7] sm:$0x7] }
 0x24e   :  { %v784_v50 = vpop.permute.xlu0 %783 }
 0x24f   :  { %939 = vmatmul.mubr.f32.gmra.mxu1 %v718_v42 }
 0x250   :  { %2130 = vmatprep.mubr.msk.f32.mxu1 %vm281_vm1, %v2698_v43 }
 0x305   :  { %v858_v45 = vpop.f32.mrf.mxu0 }
 0x306   :  { %v2702_v46 = vadd.f32 %v858_v45, %v779_v44 }
 0x307   :  { %v860_v47 = vpop.f32.mrf.mxu0 }
 0x308   :  { %v950_v48 = vmul.f32 0.044715, %v2702_v46  ;;  %v861_v49 = vadd.f32 %v860_v47, %v779_v44 }
 0x309   :  { %v864_v51 = vpop.f32.mrf.mxu0 }
 0x30a   :  { %v956_v52 = vmul.f32 %v950_v48, %v2702_v46  ;;  %v951_v53 = vmul.f32 0.044715, %v861_v49  ;;  %v865_v56 = vadd.f32 %v864_v51, %v784_v50  ;;  %v945_v45 = vmul.f32 0.5, %v861_v49 }
 0x30b   :  { %v935_v58 = vpop.f32.mrf.mxu1  ;;  %v866_v59 = vpop.f32.mrf.mxu0 }
 0x30c   :  { %v936_v60 = vadd.f32 %v935_v58, %v779_v44  ;;  %v962_v61 = vmul.f32 %v956_v52, %v2702_v46  ;;  %v957_v62 = vmul.f32 %v951_v53, %v861_v49  ;;  %v953_v0 = vmul.f32 0.044715, %v865_v56 }
 0x30d   :  { %v937_v1 = vpop.f32.mrf.mxu1  ;;  %v867_v2 = vadd.f32 %v866_v59, %v784_v50  ;;  %v947_v31 = vmul.f32 0.5, %v865_v56  ;;  %v944_v52 = vmul.f32 0.5, %v2702_v46 }
 0x30e   :  { %v952_v3 = vmul.f32 0.044715, %v936_v60  ;;  %v963_v4 = vmul.f32 %v957_v62, %v861_v49  ;;  %v959_v6 = vmul.f32 %v953_v0, %v865_v56  ;;  %v968_v7 = vadd.f32 %v962_v61, %v2702_v46 }
 0x30f   :  { %v940_v8 = vpop.f32.mrf.mxu1  ;;  %v954_v9 = vmul.f32 0.044715, %v867_v2  ;;  %v948_v38 = vmul.f32 0.5, %v867_v2  ;;  %v946_v48 = vmul.f32 0.5, %v936_v60  ;;  %v1005_v61 = vrot.slane %v1000_v36, %v2423_v57 }
 0x310   :  { %v958_v10 = vmul.f32 %v952_v3, %v936_v60  ;;  %v941_v11 = vadd.f32 %v940_v8, %v784_v50  ;;  %v965_v12 = vmul.f32 %v959_v6, %v865_v56  ;;  %v969_v16 = vadd.f32 %v963_v4, %v861_v49  ;;  %v1224_v8 = vld [vmem:[%s2930_s10 + $0xf8] sm:$0xff] }
 0x311   :  { %v960_v14 = vmul.f32 %v954_v9, %v867_v2  ;;  %v942_v15 = vpop.f32.mrf.mxu1  ;;  %v974_v13 = vmul.f32 0.7978846, %v968_v7  ;;  %v1009_v50 = vrot.slane %v1000_v36, %v2429_v63  ;;  %v1013_v1 = vrot.slane %v1000_v36, %v2417_v55  ;;  %v999_v7 = vld [vmem:[%s2925_s5 + $0x8] sm:$0xff]  ;;  %v1208_v9 = vld [vmem:[%s2930_s10 + $0x78] sm:$0xff]  ;;  %v1193_v36 = vld [vmem:[%s2930_s10] sm:$0xff] }
 0x312   :  { %v955_v17 = vmul.f32 0.044715, %v941_v11  ;;  %v971_v18 = vadd.f32 %v965_v12, %v865_v56  ;;  %v964_v22 = vmul.f32 %v958_v10, %v936_v60  ;;  %v975_v19 = vmul.f32 0.7978846, %v969_v16  ;;  %v1228_v10 = vld [vmem:[%s2930_s10 + $0x118] sm:$0xff]  ;;  %v1222_v12 = vld [vmem:[%s2930_s10 + $0xe8] sm:$0xff] }
 0x313   :  { %v966_v21 = vmul.f32 %v960_v14, %v867_v2  ;;  %v949_v53 = vmul.f32 0.5, %v941_v11  ;;  %v1206_v14 = vld [vmem:[%s2930_s10 + $0x68] sm:$0xff]  ;;  %v1221_v15 = vld [vmem:[%s2930_s10 + $0xe0] sm:$0xff] }
 0x314   :  { %v961_v23 = vmul.f32 %v955_v17, %v941_v11  ;;  %v977_v24 = vmul.f32 0.7978846, %v971_v18  ;;  %v970_v25 = vadd.f32 %v964_v22, %v936_v60  ;;  %2198 = vtanh.f32 %v975_v19  ;;  %v1205_v16 = vld [vmem:[%s2930_s10 + $0x60] sm:$0xff]  ;;  %v1220_v17 = vld [vmem:[%s2930_s10 + $0xd8] sm:$0xff]  ;;  %v1218_v22 = vld [vmem:[%s2930_s10 + $0xc8] sm:$0xff] }
 0x315   :  { %v972_v20 = vadd.f32 %v966_v21, %v867_v2  ;;  %v1204_v18 = vld [vmem:[%s2930_s10 + $0x58] sm:$0xff]  ;;  %v1203_v21 = vld [vmem:[%s2930_s10 + $0x50] sm:$0xff]  ;;  %v1202_v19 = vld [vmem:[%s2930_s10 + $0x48] sm:$0xff] }
 0x316   :  { %v967_v27 = vmul.f32 %v961_v23, %v941_v11  ;;  %2200 = vtanh.f32 %v977_v24  ;;  %v976_v29 = vmul.f32 0.7978846, %v970_v25  ;;  %v1217_v23 = vld [vmem:[%s2930_s10 + $0xc0] sm:$0xff]  ;;  %v1216_v25 = vld [vmem:[%s2930_s10 + $0xb8] sm:$0xff] }
 0x317   :  { %2202 = vtanh.f32 %v974_v13  ;;  %v978_v28 = vmul.f32 0.7978846, %v972_v20  ;;  %v1219_v13 = vld [vmem:[%s2930_s10 + $0xd0] sm:$0xff]  ;;  %v1201_v24 = vld [vmem:[%s2930_s10 + $0x40] sm:$0xff]  ;;  %v1200_v20 = vld [vmem:[%s2930_s10 + $0x38] sm:$0xff] }
 0x318   :  { %v973_v30 = vadd.f32 %v967_v27, %v941_v11  ;;  %2204 = vtanh.f32 %v976_v29  ;;  %v1223_v11 = vld [vmem:[%s2930_s10 + $0xf0] sm:$0xff] }
 0x319   :  { %2206 = vtanh.f32 %v978_v28  ;;  %v1215_v27 = vld [vmem:[%s2930_s10 + $0xb0] sm:$0xff]  ;;  %v1214_v28 = vld [vmem:[%s2930_s10 + $0xa8] sm:$0xff] }
 0x31a   :  { %v979_v32 = vmul.f32 0.7978846, %v973_v30  ;;  %v1199_v29 = vld [vmem:[%s2930_s10 + $0x30] sm:$0xff]  ;;  %v1198_v30 = vld [vmem:[%s2930_s10 + $0x28] sm:$0xff] }
 0x31c   :  { %2208 = vtanh.f32 %v979_v32  ;;  %v1213_v32 = vld [vmem:[%s2930_s10 + $0xa0] sm:$0xff] }
 0x321   :  { %v2199_v26 = vpop.eup %2198 }
 0x322   :  { %v987_v39 = vadd.f32 1.0, %v2199_v26  ;;  %v1197_v26 = vld [vmem:[%s2930_s10 + $0x20] sm:$0xff] }
 0x323   :  { %v2201_v34 = vpop.eup %2200 }
 0x324   :  { %v2203_v35 = vpop.eup %2202  ;;  %v989_v37 = vadd.f32 1.0, %v2201_v34  ;;  %v993_v56 = vmul.f32 %v987_v39, %v945_v45  ;;  %v1212_v34 = vld [vmem:[%s2930_s10 + $0x98] sm:$0xff]  ;;  %v1210_v39 = vld [vmem:[%s2930_s10 + $0x88] sm:$0xff] }
 0x325   :  { %v2205_v33 = vpop.eup %2204  ;;  %v986_v41 = vadd.f32 1.0, %v2203_v35  ;;  %v1196_v35 = vld [vmem:[%s2930_s10 + $0x18] sm:$0xff] }
 0x326   :  { %v2207_v40 = vpop.eup %2206  ;;  %v988_v42 = vadd.f32 1.0, %v2205_v33  ;;  %v995_v51 = vmul.f32 %v989_v37, %v947_v31  ;;  %v1018_v60 = vmul.f32 %v1009_v50, %v993_v56  ;;  %v1211_v37 = vld [vmem:[%s2930_s10 + $0x90] sm:$0xff] }
 0x327   :  { %v990_v44 = vadd.f32 1.0, %v2207_v40  ;;  %v992_v62 = vmul.f32 %v986_v41, %v944_v52  ;;  %v1195_v33 = vld [vmem:[%s2930_s10 + $0x10] sm:$0xff]  ;;  %v1194_v40 = vld [vmem:[%s2930_s10 + $0x8] sm:$0xff]  ;;  %v1209_v41 = vld [vmem:[%s2930_s10 + $0x80] sm:$0xff] }
 0x328   :  { %v994_v2 = vmul.f32 %v988_v42, %v946_v48  ;;  %v1020_v49 = vmul.f32 %v1005_v61, %v995_v51  ;;  %v1227_v31 = vld [vmem:[%s2930_s10 + $0x110] sm:$0xff]  ;;  %v1226_v42 = vld [vmem:[%s2930_s10 + $0x108] sm:$0xff] }
 0x329   :  { %v2209_v47 = vpop.eup %2208  ;;  %v996_v59 = vmul.f32 %v990_v44, %v948_v38  ;;  %v1017_v6 = vmul.f32 %v1005_v61, %v992_v62  ;;  %v1225_v38 = vld [vmem:[%s2930_s10 + $0x100] sm:$0xff]  ;;  %v2230_v44 = vld [vmem:[%s2920_s0 + $0x10] sm:$0xff] }
 0x32a   :  { %v991_v58 = vadd.f32 1.0, %v2209_v47  ;;  %v1019_v46 = vmul.f32 %v1013_v1, %v994_v2  ;;  %v1028_v47 = vpop.permute.xlu0 %1027  ;;  %v2856_v2 = vld [vmem:[%s2932_s12] sm:$0xff] }
 0x32b   :  { %v1021_v3 = vmul.f32 %v1009_v50, %v996_v59  ;;  %v1033_v59 = vpop.permute.xlu1 %1032 }
 0x32c   :  { %v997_v0 = vmul.f32 %v991_v58, %v949_v53 }
 0x32d   :  { %1069 = vmatprep.subr.mxu0 %v1021_v3  ;;  %v2865_v3 = vld [vmem:[%s2932_s12 + $0x8] sm:$0xff] }
 0x32e   :  { %v1022_v4 = vmul.f32 %v1013_v1, %v997_v0  ;;  %1070 = vmatpush1.msra.mxu0 %v1020_v49 }
 0x32f   :  { %1071 = vmatprep.subr.mxu0 %v1018_v60 }
 0x330   :  { %2126 = vmatprep.subr.mxu1 %v1022_v4  ;;  %1072 = vmatpush1.msra.mxu0 %v1017_v6 }
 0x331   :  { %2127 = vmatpush3.msra.mxu1 %v1022_v4  ;;  %2035 = vmatmul.mubr.msk.f32.vlgmr.msra.gmra.mxu0 %vm281_vm1, %v2698_v43  ;;  %v1207_v43 = vld [vmem:[%s2930_s10 + $0x70] sm:$0xff] }
 0x332   :  { %2128 = vmatprep.subr.mxu1 %v1019_v46  ;;  %1111 = vmatprep.mubr.f32.mxu0 %v2255_v5 }
 0x333   :  { %2129 = vmatpush3.msra.mxu1 %v1019_v46  ;;  %2065 = vmatprep.subr.mxu0 %v1224_v8 }
 0x334   :  { %2131 = vmatmul.mubr.msk.f32.vlgmr.msra.gmra.mxu1 %vm281_vm1, %v999_v7  ;;  %2066 = vmatpush3.msra.mxu0 %v1208_v9 }
 0x335   :  { %2133 = vmatprep.subr.mxu1 %v1228_v10  ;;  %2036 = vmatmul.mubr.msk.f32.gmra.mxu0 %vm281_vm1, %v999_v7 }
 0x336   :  { %2067 = vmatprep.subr.mxu0 %v1223_v11  ;;  %2134 = vmatpush3.msra.mxu1 %v1228_v10 }
 0x337   :  { %2068 = vmatpush3.msra.mxu0 %v1207_v43  ;;  %2135 = vmatprep.subr.mxu1 %v1227_v31  ;;  %v1385_v43 = vld [vmem:[%s2928_s8] sm:$0xf] }
 0x338   :  { %2069 = vmatprep.subr.mxu0 %v1222_v12  ;;  %2136 = vmatpush3.msra.mxu1 %v1227_v31  ;;  %v1460_v12 = vld [vmem:[%s2929_s9] sm:$0xff] }
 0x339   :  { %2070 = vmatpush3.msra.mxu0 %v1206_v14  ;;  %2137 = vmatprep.subr.mxu1 %v1226_v42 }
 0x33a   :  { %2071 = vmatprep.subr.mxu0 %v1221_v15  ;;  %2138 = vmatpush3.msra.mxu1 %v1226_v42  ;;  %v1756_v42 = vpop.permute.xlu1 %1755 }
 0x33b   :  { %2072 = vmatpush3.msra.mxu0 %v1205_v16  ;;  %2139 = vmatprep.subr.mxu1 %v1225_v38 }
 0x33c   :  { %2073 = vmatprep.subr.mxu0 %v1220_v17  ;;  %2140 = vmatpush3.msra.mxu1 %v1225_v38  ;;  %v1461_v17 = vld [vmem:[%s2929_s9 + $0x8] sm:$0xff] }
 0x33d   :  { %2074 = vmatpush3.msra.mxu0 %v1204_v18  ;;  %2144 = vmatprep.subr.mxu1 %v2255_v5  ;;  %v2268_v18 = vmov 1983009808  }
 0x33e   :  { %2075 = vmatprep.subr.mxu0 %v1219_v13  ;;  %v1564_v13 = vunpack.c.l.s4 %v2268_v18 }
 0x33f   :  { %2076 = vmatpush3.msra.mxu0 %v1203_v21 }
 0x340   :  { %2077 = vmatprep.subr.mxu0 %v1218_v22  ;;  %v1565_v21 = vunpack.c.0.s8 %v1564_v13  ;;  %v1560_v22 = vld [vmem:[%s2931_s11] sm:$0x3f] }
 0x341   :  { %2078 = vmatpush3.msra.mxu0 %v1202_v19 }
 0x342   :  { %2079 = vmatprep.subr.mxu0 %v1217_v23  ;;  %v1568_v19 = vsub.s32 %v1565_v21, %v2410_v54 }
 0x343   :  { %2080 = vmatpush3.msra.mxu0 %v1201_v24 }
 0x344   :  { %2081 = vmatprep.subr.mxu0 %v1216_v25  ;;  %v1569_v23 = vrot.slane %v1560_v22, %v1568_v19  ;;  %v1562_v25 = vcombine.high %v1560_v22, %v1560_v22 }
 0x345   :  { %2082 = vmatpush3.msra.mxu0 %v1200_v20 }
 0x346   :  { %2083 = vmatprep.subr.mxu0 %v1215_v27  ;;  %v1577_v24 = vcombine.high %v1569_v23, %v1569_v23  ;;  %v1576_v20 = vrot.slane %v1562_v25, %v1568_v19 }
 0x347   :  { %2084 = vmatpush3.msra.mxu0 %v1199_v29 }
 0x348   :  { %2085 = vmatprep.subr.mxu0 %v1214_v28 }
 0x349   :  { %2086 = vmatpush3.msra.mxu0 %v1198_v30 }
 0x34a   :  { %2087 = vmatprep.subr.mxu0 %v1213_v32 }
 0x34b   :  { %2088 = vmatpush3.msra.mxu0 %v1197_v26 }
 0x34c   :  { %2089 = vmatprep.subr.mxu0 %v1212_v34 }
 0x34d   :  { %2090 = vmatpush3.msra.mxu0 %v1196_v35 }
 0x34e   :  { %2091 = vmatprep.subr.mxu0 %v1211_v37  ;;  %v2231_v37 = vld [vmem:[%s2920_s0 + $0x8] sm:$0xff] }
 0x34f   :  { %2092 = vmatpush3.msra.mxu0 %v1195_v33 }
 0x350   :  { %2093 = vmatprep.subr.mxu0 %v1210_v39  ;;  %v2232_v39 = vld [vmem:[%s2920_s0] sm:$0xff]  ;;  %s2269_s0 = smov [#allocation4]  }
 0x351   :  { %2094 = vmatpush3.msra.mxu0 %v1194_v40 }
 0x352   :  { %2095 = vmatprep.subr.mxu0 %v1209_v41  ;;  %v1916_v41 = vld [vmem:[%s2934_s14] sm:$0x7]  ;;  %s2016_s14 = sshll.u32 %s2269_s0, 4  ;;  %s2017_s14 = int_to_ptr.vmem [resolvable:$true] %s2016_s14 }
 0x353   :  { %2096 = vmatpush3.msra.mxu0 %v1193_v36  ;;  %s2233_s28 = scalar_lea.vmem %s2017_s14, 768  ;;  %p2238_p1 = scmp.lt.s32.totalorder %s2017_s14, %s2017_s14 }
 0x354   :  { %2161 = vmatprep.subr.mxu0 %v2230_v44  ;;  %p2234_p0 = scmp.ne.s32.totalorder %s2017_s14, %s2233_s28  ;;  %p2239_p2 = scmp.lt.s32.totalorder %s2233_s28, %s2233_s28 }
 0x356   :  { %p2240_p3 = por %p2239_p2, %p2238_p1 }
 0x358   :  { %p2241_p4 = pnand %p2240_p3, %p2234_p0 }
 0x3f1   :  { %v1107_v45 = vpop.f32.mrf.mxu0 }
 0x3f2   :  { %v2837_v53 = vadd.f32 %v1107_v45, %v1028_v47 }
 0x3f3   :  { %v1109_v50 = vpop.f32.mrf.mxu0 }
 0x3f4   :  { %v2132_v48 = vpop.f32.mrf.mxu1  ;;  %v2835_v51 = vadd.f32 %v1109_v50, %v1028_v47 }
 0x3f5   :  { %v1113_v58 = vpop.f32.mrf.mxu0  ;;  %v2842_v61 = vadd.f32 %v2132_v48, %v1033_v59  ;;  %v1751_v48 = vpop.permute.xlu0 %1750 }
 0x3f6   :  { %v1184_v52 = vpop.f32.mrf.mxu1  ;;  %1299 = vmatprep.mubr.f32.mxu0 %v2835_v51  ;;  %v2851_v1 = vadd.f32 %v1113_v58, %v1033_v59 }
 0x3f7   :  { %v2839_v56 = vadd.f32 %v1184_v52, %v1028_v47  ;;  %v1115_v62 = vpop.f32.mrf.mxu0  ;;  %1300 = vmatmul.mubr.f32.vlgmr.msra.gmra.mxu0 %v2837_v53  ;;  %v1929_v47 = vrot.slane %v1916_v41, %v2417_v55  ;;  %v1925_v55 = vrot.slane %v1916_v41, %v2429_v63 }
 0x3f8   :  { %v2847_v0 = vadd.f32 %v1115_v62, %v1033_v59  ;;  %2162 = vmatpush3.msra.mxu0 %v2230_v44 }
 0x3f9   :  { %2141 = vmatprep.mubr.msk.f32.mxu1 %vm383_vm5, %v2839_v56 }
 0x3fa   :  { %2142 = vmatmul.mubr.msk.f32.vlgmr.msra.gmra.mxu1 %vm383_vm5, %v2842_v61  ;;  %1304 = vmatprep.mubr.f32.mxu0 %v2847_v0 }
 0x3fb   :  { %1305 = vmatmul.mubr.f32.gmra.mxu0 %v2851_v1  ;;  %2148 = vmatprep.mubr.msk.f32.mxu1 %vm2267_vm15, %v2255_v5 }
 0x3fc   :  { %2163 = vmatprep.mubr.msk.f32.mxu0 %vm68_vm0, %v2856_v2 }
 0x3ff   :  { %2164 = vmatmul.mubr.msk.f32.vlgmr.msra.gmra.mxu0 %vm68_vm0, %v2865_v3 }
 0x4b7   :  { %v2097_v49 = vpop.f32.mrf.mxu0 }
 0x4b9   :  { %v2098_v4 = vpop.f32.mrf.mxu0 }
 0x4ba   :  { %v2143_v60 = vpop.f32.mrf.mxu1  ;;  %v2099_v9 = vadd.f32 %v2098_v4, %v2097_v49  ;;  %v1921_v4 = vrot.slane %v1916_v41, %v2423_v57 }
 0x4bb   :  { %v2100_v6 = vpop.f32.mrf.mxu0 }
 0x4bc   :  { %v1376_v8 = vpop.f32.mrf.mxu1 }
 0x4bd   :  { %v2101_v46 = vpop.f32.mrf.mxu0  ;;  %v1377_v11 = vadd.f32 %v2099_v9, %v1376_v8 }
 0x4be   :  { %v2102_v7 = vadd.f32 %v2101_v46, %v2100_v6 }
 0x4bf   :  { %v2165_v40 = vpop.f32.mrf.mxu0 }
 0x4c0   :  { %v1382_v10 = vadd.f32 %v2143_v60, %v2102_v7  ;;  %v1913_v45 = vadd.f32 %v2165_v40, %v1756_v42 }
 0x4c1   :  { %v1907_v38 = vpop.f32.mrf.mxu0 }
 0x4c2   :  { %2145 = vmatpush3.msra.mxu1 %v1382_v10  ;;  %v1908_v52 = vadd.f32 %v1907_v38, %v1751_v48  ;;  %v1938_v58 = vmul.f32 %v1929_v47, %v1913_v45 }
 0x4c3   :  { %2146 = vmatprep.subr.mxu1 %v2255_v5 }
 0x4c4   :  { %2147 = vmatpush3.msra.mxu1 %v1377_v11 }
 0x4c5   :  { %2149 = vmatmul.mubr.msk.f32.vlgmr.msra.gmra.mxu1 %vm281_vm1, %v1385_v43  ;;  %vm1585_vm1 = vcmask 1041408  }
 0x4c6   :  { %2153 = vmatprep.mubr.msk.f32.mxu1 %vm1462_vm2, %v1460_v12 }
 0x585   :  { %v1455_v14 = vpop.f32.mrf.mxu1 }
 0x586   :  { %v1459_v15 = vmax.f32 %v1455_v14, 0.0 }
 0x587   :  { %v2150_v16 = vpop.f32.mrf.mxu1 }
 0x588   :  { %2151 = vmatprep.subr.msk.mxu1 %vm1469_vm3, %v1459_v15 }
 0x589   :  { %2152 = vmatpush3.msk.msra.mxu1 %vm1469_vm3, %v1459_v15 }
 0x58a   :  { %2154 = vmatmul.mubr.msk.f32.vlgmr.msra.gmra.mxu1 %vm1462_vm2, %v1461_v17  ;;  %2047 = vmatprep.subr.msk.mxu1 %vm1585_vm1, %v1577_v24 }
 0x58b   :  { %1656 = vmatprep.mubr.f32.mxu1 %v2255_v5  ;;  %2048 = vmatpush1.msk.msra.mxu1 %vm1585_vm1, %v1569_v23 }
 0x58c   :  { %2156 = vmatprep.subr.msk.mxu1 %vm1585_vm1, %v1576_v20 }
 0x64a   :  { %v2155_v27 = vpop.f32.mrf.mxu1 }
 0x64b   :  { %v2046_v29 = vmul.f32 -1.442695, %v2155_v27 }
 0x64c   :  { %v1539_v28 = vpop.f32.mrf.mxu1 }
 0x64d   :  { %v2045_v30 = vmul.f32 -1.442695, %v1539_v28  ;;  %2210 = vpow2.f32 %v2046_v29 }
 0x64f   :  { %2212 = vpow2.f32 %v2045_v30 }
 0x65a   :  { %v2211_v32 = vpop.eup %2210 }
 0x65b   :  { %v1555_v34 = vadd.f32 1.0, %v2211_v32 }
 0x65c   :  { %v2213_v26 = vpop.eup %2212 }
 0x65d   :  { %v1554_v54 = vadd.f32 1.0, %v2213_v26 }
 0x65f   :  { %2214 = vrcp.f32 %v1554_v54 }
 0x660   :  { %2216 = vrcp.f32 %v1555_v34 }
 0x66c   :  { %v2215_v35 = vpop.eup %2214 }
 0x66d   :  { %2049 = vmatmul.mubr.msk.f32.vlgmr.msra.gmra.mxu1 %vm1578_vm4, %v2215_v35  ;;  %v2217_v33 = vpop.eup %2216 }
 0x66e   :  { %1662 = vmatprep.mubr.f32.mxu1 %v2255_v5  ;;  %2157 = vmatpush3.msk.msra.mxu1 %vm1585_vm1, %v1576_v20 }
 0x66f   :  { %1794 = vmatprep.subr.mxu1 %v2231_v37 }
 0x671   :  { %2050 = vmatmul.mubr.msk.f32.gmra.mxu1 %vm1578_vm4, %v2217_v33 }
 0x672   :  { %2158 = vmatprep.mubr.msk.f32.mxu1 %vm1578_vm4, %v2215_v35 }
 0x675   :  { %2159 = vmatmul.mubr.msk.f32.vlgmr.msra.gmra.mxu1 %vm1578_vm4, %v2217_v33 }
 0x676   :  { %1795 = vmatpush1.msra.mxu1 %v2232_v39  ;;  %1828 = vmatprep.mubr.f32.mxu1 %v2255_v5 }
 0x679   :  { %2054 = vmatmul.mubr.msk.f32.vlgmr.msra.gmra.mxu1 %vm68_vm0, %v2856_v2  ;;  %v1935_v2 = vmul.f32 %v1929_v47, %v1908_v52 }
 0x67a   :  { %1834 = vmatprep.mubr.f32.mxu1 %v2255_v5 }
 0x67d   :  { %2055 = vmatmul.mubr.msk.f32.gmra.mxu1 %vm68_vm0, %v2865_v3 }
 0x72d   :  { %v1658_v31 = vpop.f32.mrf.mxu1 }
 0x72e   :  { %v1939_v9 = vmul.f32 %v1658_v31, %v2837_v53 }
 0x72f   :  { %v1660_v36 = vpop.f32.mrf.mxu1 }
 0x730   :  { %v1940_v57 = vmul.f32 %v1660_v36, %v2835_v51 }
 0x731   :  { %v1664_v44 = vpop.f32.mrf.mxu1 }
 0x732   :  { %v1942_v63 = vmul.f32 %v1664_v44, %v2851_v1 }
 0x733   :  { %v1666_v50 = vpop.f32.mrf.mxu1 }
 0x734   :  { %v1943_v27 = vmul.f32 %v1666_v50, %v2847_v0 }
 0x735   :  { %v2160_v5 = vpop.f32.mrf.mxu1 }
 0x736   :  { %v1944_v59 = vmul.f32 %v2160_v5, %v2842_v61 }
 0x737   :  { %v1735_v62 = vpop.f32.mrf.mxu1 }
 0x738   :  { %v1950_v3 = vadd.f32 %v1944_v59, %v1938_v58  ;;  %v1941_v49 = vmul.f32 %v1735_v62, %v2839_v56 }
 0x739   :  { %v1830_v60 = vpop.f32.mrf.mxu1 }
 0x73a   :  { %v1962_v6 = vmul.f32 0.044715, %v1950_v3  ;;  %v1947_v46 = vadd.f32 %v1941_v49, %v1935_v2  ;;  %v1831_v7 = vadd.f32 %v1830_v60, %v1751_v48 }
 0x73b   :  { %v1832_v8 = vpop.f32.mrf.mxu1 }
 0x73c   :  { %v1968_v10 = vmul.f32 %v1962_v6, %v1950_v3  ;;  %v1959_v11 = vmul.f32 0.044715, %v1947_v46  ;;  %v1933_v43 = vmul.f32 %v1921_v4, %v1831_v7  ;;  %v1833_v61 = vadd.f32 %v1832_v8, %v1751_v48 }
 0x73d   :  { %v1836_v12 = vpop.f32.mrf.mxu1  ;;  %v1956_v48 = vmul.f32 0.5, %v1950_v3  ;;  %v1953_v58 = vmul.f32 0.5, %v1947_v46 }
 0x73e   :  { %v1974_v14 = vmul.f32 %v1968_v10, %v1950_v3  ;;  %v1965_v15 = vmul.f32 %v1959_v11, %v1947_v46  ;;  %v1945_v16 = vadd.f32 %v1939_v9, %v1933_v43  ;;  %v1837_v56 = vadd.f32 %v1836_v12, %v1756_v42 }
 0x73f   :  { %v1934_v17 = vmul.f32 %v1925_v55, %v1833_v61  ;;  %v1838_v18 = vpop.f32.mrf.mxu1 }
 0x740   :  { %v1980_v13 = vadd.f32 %v1974_v14, %v1950_v3  ;;  %v1971_v21 = vmul.f32 %v1965_v15, %v1947_v46  ;;  %v1957_v22 = vmul.f32 0.044715, %v1945_v16  ;;  %v1936_v53 = vmul.f32 %v1921_v4, %v1837_v56 }
 0x741   :  { %v1946_v19 = vadd.f32 %v1940_v57, %v1934_v17  ;;  %v1839_v23 = vadd.f32 %v1838_v18, %v1756_v42  ;;  %v1951_v49 = vmul.f32 0.5, %v1945_v16 }
 0x742   :  { %v1986_v24 = vmul.f32 0.7978846, %v1980_v13  ;;  %v1977_v25 = vadd.f32 %v1971_v21, %v1947_v46  ;;  %v1963_v20 = vmul.f32 %v1957_v22, %v1945_v16  ;;  %v1948_v28 = vadd.f32 %v1942_v63, %v1936_v53 }
 0x743   :  { %v1958_v29 = vmul.f32 0.044715, %v1946_v19  ;;  %v1937_v30 = vmul.f32 %v1925_v55, %v1839_v23  ;;  %v1952_v7 = vmul.f32 0.5, %v1946_v19 }
 0x744   :  { %2218 = vtanh.f32 %v1986_v24  ;;  %v1983_v51 = vmul.f32 0.7978846, %v1977_v25  ;;  %v1969_v32 = vmul.f32 %v1963_v20, %v1945_v16  ;;  %v1960_v54 = vmul.f32 0.044715, %v1948_v28 }
 0x745   :  { %v1964_v26 = vmul.f32 %v1958_v29, %v1946_v19  ;;  %v1949_v34 = vadd.f32 %v1943_v27, %v1937_v30  ;;  %v1954_v9 = vmul.f32 0.5, %v1948_v28 }
 0x746   :  { %2220 = vtanh.f32 %v1983_v51  ;;  %v1975_v35 = vadd.f32 %v1969_v32, %v1945_v16  ;;  %v1966_v37 = vmul.f32 %v1960_v54, %v1948_v28 }
 0x747   :  { %v1970_v1 = vmul.f32 %v1964_v26, %v1946_v19  ;;  %v1961_v33 = vmul.f32 0.044715, %v1949_v34  ;;  %v1955_v43 = vmul.f32 0.5, %v1949_v34 }
 0x748   :  { %v1981_v39 = vmul.f32 0.7978846, %v1975_v35  ;;  %v1972_v31 = vmul.f32 %v1966_v37, %v1948_v28 }
 0x749   :  { %v1976_v40 = vadd.f32 %v1970_v1, %v1946_v19  ;;  %v1967_v41 = vmul.f32 %v1961_v33, %v1949_v34 }
 0x74a   :  { %2222 = vtanh.f32 %v1981_v39  ;;  %v1978_v36 = vadd.f32 %v1972_v31, %v1948_v28 }
 0x74b   :  { %v1982_v0 = vmul.f32 0.7978846, %v1976_v40  ;;  %v1973_v42 = vmul.f32 %v1967_v41, %v1949_v34 }
 0x74c   :  { %v1984_v38 = vmul.f32 0.7978846, %v1978_v36 }
 0x74d   :  { %2224 = vtanh.f32 %v1982_v0  ;;  %v1979_v44 = vadd.f32 %v1973_v42, %v1949_v34 }
 0x74e   :  { %2226 = vtanh.f32 %v1984_v38 }
 0x74f   :  { %v1985_v45 = vmul.f32 0.7978846, %v1979_v44 }
 0x751   :  { %v2219_v47 = vpop.eup %2218  ;;  %2228 = vtanh.f32 %v1985_v45 }
 0x752   :  { %v1998_v50 = vadd.f32 1.0, %v2219_v47 }
 0x753   :  { %v2221_v52 = vpop.eup %2220 }
 0x754   :  { %v2004_v5 = vmul.f32 %v1998_v50, %v1956_v48  ;;  %v1995_v59 = vadd.f32 1.0, %v2221_v52 }
 0x756   :  { %2010 = vst.msk [vmem:[#allocation4 + $0x28] sm:$0xff] %vm383_vm5, %v2004_v5  ;;  %v2001_v62 = vmul.f32 %v1995_v59, %v1953_v58 }
 0x757   :  { %v2223_v2 = vpop.eup %2222 }
 0x758   :  { %2007 = vst.msk [vmem:[#allocation4 + $0x10] sm:$0xff] %vm383_vm5, %v2001_v62  ;;  %v1993_v4 = vadd.f32 1.0, %v2223_v2 }
 0x75a   :  { %v2225_v60 = vpop.eup %2224  ;;  %v1999_v6 = vmul.f32 %v1993_v4, %v1951_v49 }
 0x75b   :  { %v1994_v8 = vadd.f32 1.0, %v2225_v60  ;;  %v2227_v55 = vpop.eup %2226 }
 0x75c   :  { %2005 = vst [vmem:[#allocation4] sm:$0xff] %v1999_v6  ;;  %v1996_v10 = vadd.f32 1.0, %v2227_v55 }
 0x75d   :  { %v2000_v3 = vmul.f32 %v1994_v8, %v1952_v7 }
 0x75e   :  { %v2229_v46 = vpop.eup %2228  ;;  %v2002_v11 = vmul.f32 %v1996_v10, %v1954_v9 }
 0x75f   :  { %2006 = vst [vmem:[#allocation4 + $0x8] sm:$0xff] %v2000_v3  ;;  %v1997_v61 = vadd.f32 1.0, %v2229_v46 }
 0x760   :  { %2008 = vst [vmem:[#allocation4 + $0x18] sm:$0xff] %v2002_v11 }
 0x761   :  { %v2003_v12 = vmul.f32 %v1997_v61, %v1955_v43 }
 0x763   :  { %2009 = vst [vmem:[#allocation4 + $0x20] sm:$0xff] %v2003_v12 }
 0x764   :  { %2244 = shalt.err (!%p2241_p4)
}
 0x765   :  { %s2270_s3 = smov 384   ;;  %s2271_s29 = smov 24  }
 0x766   :  { %2022 = dma.vmem_to_hbm [thread:$0]  %s2017_s14, 768, %s2935_s15, [#allocation5], %s2270_s3, %s2270_s3, %s2271_s29  }
 0x767   :  { %2253 = dma.done.wait [#allocation5], 768  }
 0x768   :  { %2254 = vsyncadd [#allocation5], 4294966528 }
 0x769   :  { %2026 = vsyncpa [#allocation5], 1 }

</bundles_post_ra>
